<compile_context>
chip_gen: v7x
topology: tpu7x:2x2x1
jax: 0.10.0
libtpu: 0.0.40
codegen_flags: <defaults>
</compile_context>

<pallas_src>
import jax
import jax.numpy as jnp
from jax.experimental import pallas as pl
from jax.experimental.pallas import tpu as pltpu


def _residual_dwconv_bn_kernel(xs_ref, xt_ref, xb_ref, w_ref, b_ref, o_ref,
                               xpad_ref):
    # xs_ref   : (NB, SH, W, CT)   input strip (also supplies the residual)
    # xt_ref   : (NB, 1,  W, CT)   row just above the strip (garbage at h==0)
    # xb_ref   : (NB, 1,  W, CT)   row just below the strip (garbage at last h)
    # w_ref    : (3, 3, CT)        BN-folded depthwise weights (f32)
    # b_ref    : (1, CT)           BN-folded bias (f32)
    # o_ref    : (NB, SH, W, CT)   output strip
    # xpad_ref : VMEM scratch (NB, SH+2, W+2, CT), x.dtype -- zero-halo strip
    NB, SH, W, CT = xs_ref.shape
    h = pl.program_id(1)
    last_h = pl.num_programs(1) - 1

    # --- build the padded strip: zero only the thin borders (perf review) ---
    zcol = jnp.zeros((NB, SH + 2, 1, CT), dtype=xpad_ref.dtype)
    xpad_ref[:, :, 0:1, :] = zcol                 # left halo column (incl. corners)
    xpad_ref[:, :, W + 1:W + 2, :] = zcol         # right halo column (incl. corners)

    zrow = jnp.zeros((NB, 1, W, CT), dtype=xpad_ref.dtype)

    @pl.when(h == 0)
    def _():                                      # image top edge -> zeros
        xpad_ref[:, 0:1, 1:W + 1, :] = zrow

    @pl.when(h > 0)
    def _():                                      # last row of previous strip
        xpad_ref[:, 0:1, 1:W + 1, :] = xt_ref[...]

    @pl.when(h == last_h)
    def _():                                      # image bottom edge -> zeros
        xpad_ref[:, SH + 1:SH + 2, 1:W + 1, :] = zrow

    @pl.when(h < last_h)
    def _():                                      # first row of next strip
        xpad_ref[:, SH + 1:SH + 2, 1:W + 1, :] = xb_ref[...]

    # Interior copy: the only full-tile write besides the output store.
    # TODO(synk): a manually double-buffered DMA of x straight into this
    # interior (memory_space=pl.ANY) would remove this copy pass as well.
    xpad_ref[:, 1:SH + 1, 1:W + 1, :] = xs_ref[...]

    # Hoist weight / bias loads out of the 9-tap loop.
    w = w_ref[...].astype(jnp.float32)            # (3, 3, CT)
    b = b_ref[0, :].astype(jnp.float32)           # (CT,)

    acc = jnp.broadcast_to(b, (NB, SH, W, CT)).astype(jnp.float32)
    # Depthwise 3x3 conv = 9 shifted multiply-adds (VPU elementwise, lanes = C).
    # Same-dx taps are grouped so the sublane (W-axis) realignment of each dx
    # shift can be reused; dy shifts are outer-dim slices (free).
    for dx in range(3):
        for dy in range(3):
            acc = acc + (xpad_ref[:, dy:dy + SH, dx:dx + W, :]
                         .astype(jnp.float32) * w[dy, dx, :])

    res = xs_ref[...].astype(jnp.float32)         # residual = original x
    o_ref[...] = (res + acc).astype(o_ref.dtype)


def _pick_blocks(N, H, W, C, itemsize, max_block_bytes):
    """Choose (n_blk, h_blk, c_tile) targeting ~max_block_bytes per input block."""
    LANE = 128
    # Lane-dense channel tiles when possible; small/odd C falls back to a single
    # full-C block (legal; masked lane stores -- demo only, don't ship that).
    c_tile = LANE if C % LANE == 0 else C
    row_bytes = W * c_tile * itemsize

    if N * H * row_bytes <= max_block_bytes:
        n_blk, h_blk = N, H                       # fold the whole batch in
    elif H * row_bytes <= max_block_bytes:
        n_blk, h_blk = 1, H                       # full image per step
    else:
        n_blk, h_blk = 1, 1                       # H-strip tiling (v7x VMEM fit)
        for d in range(H, 0, -1):
            if H % d == 0 and d * row_bytes <= max_block_bytes:
                h_blk = d
                break

    # v7x megacore: make sure there is more than one parallel grid step when the
    # shape allows it (otherwise one TensorCore sits idle).
    if n_blk == N and N > 1 and (H // h_blk) * (C // c_tile) == 1:
        n_blk = 1
    return n_blk, h_blk, c_tile


def _vmem_limit_bytes(need_bytes):
    try:
        cap_hw = pltpu.get_tpu_info().vmem_capacity_bytes
    except Exception:
        cap_hw = 128 << 20
    # ~48 MiB cap on v7x (64 MiB physical), ~96-100 MiB on v5e/v6e (128 MiB).
    cap = min(int(cap_hw * 3 // 4), 100 << 20)
    return int(min(max(need_bytes + (4 << 20), 16 << 20), cap))


def residual_dwconv_bn_nhwc(x, w3x3c, bias_c, *, max_block_bytes=4 << 20):
    """NHWC-native entry point.

    x      : (N, H, W, C)   activations (f32 or bf16)
    w3x3c  : (3, 3, C)      BN-folded depthwise weights (f32)
    bias_c : (C,)           BN-folded bias (f32)
    """
    N, H, W, C = x.shape
    itemsize = jnp.dtype(x.dtype).itemsize
    n_blk, h_blk, c_tile = _pick_blocks(N, H, W, C, itemsize, max_block_bytes)
    gn, gh, gc = N // n_blk, H // h_blk, C // c_tile

    b2d = bias_c.reshape(1, C).astype(jnp.float32)
    w3 = w3x3c.astype(jnp.float32)

    # Per-step VMEM budget: double-buffered in/out blocks + the halo scratch.
    blk = n_blk * h_blk * W * c_tile * itemsize
    halo = n_blk * W * c_tile * itemsize
    wb = (9 + 1) * c_tile * 4
    scratch = n_blk * (h_blk + 2) * (W + 2) * c_tile * itemsize
    need = 2 * (blk + 2 * halo + wb + blk) + scratch
    vmem_limit = _vmem_limit_bytes(need)

    in_specs = [
        # current strip (residual comes from this same block -> single HBM read)
        pl.BlockSpec((n_blk, h_blk, W, c_tile),
                     lambda n, h, c: (n, h, 0, c)),
        # 1-row halo above the strip (clamped at the top edge; zeroed in-kernel)
        pl.BlockSpec((n_blk, 1, W, c_tile),
                     lambda n, h, c: (n, jnp.maximum(h * h_blk - 1, 0), 0, c)),
        # 1-row halo below the strip (clamped at the bottom edge)
        pl.BlockSpec((n_blk, 1, W, c_tile),
                     lambda n, h, c: (n, jnp.minimum((h + 1) * h_blk, H - 1), 0, c)),
        # BN-folded weights / bias, per channel tile
        pl.BlockSpec((3, 3, c_tile), lambda n, h, c: (0, 0, c)),
        pl.BlockSpec((1, c_tile), lambda n, h, c: (0, c)),
    ]
    out_spec = pl.BlockSpec((n_blk, h_blk, W, c_tile),
                            lambda n, h, c: (n, h, 0, c))

    return pl.pallas_call(
        _residual_dwconv_bn_kernel,
        out_shape=jax.ShapeDtypeStruct((N, H, W, C), x.dtype),
        grid_spec=pltpu.PrefetchScalarGridSpec(
            num_scalar_prefetch=0,
            grid=(gn, gh, gc),
            in_specs=in_specs,
            out_specs=out_spec,
            scratch_shapes=[
                pltpu.VMEM((n_blk, h_blk + 2, W + 2, c_tile), x.dtype),
            ],
        ),
        compiler_params=pltpu.CompilerParams(
            dimension_semantics=("parallel", "parallel", "parallel"),
            vmem_limit_bytes=vmem_limit),
    )(x, x, x, w3, b2d)


def residual_dwconv_bn(x_nchw, conv_weight, bn_gamma, bn_beta, bn_mean, bn_var,
                       eps=1e-5, max_block_bytes=4 << 20):
    """PyTorch-layout wrapper. x_nchw: (N,C,H,W); conv_weight: (C,1,3,3) (groups=C).

    TODO(synk): the NCHW<->NHWC transposes exist only to match the PyTorch
    calling convention; an end-to-end NHWC model should call
    residual_dwconv_bn_nhwc directly and skip both HBM transpose passes.
    """
    N, C, H, W = x_nchw.shape
    x = jnp.transpose(x_nchw, (0, 2, 3, 1))                       # (N, H, W, C)

    # Fold eval-mode BatchNorm into the depthwise conv weight / bias.
    scale = bn_gamma / jnp.sqrt(bn_var + eps)                     # (C,)
    shift = bn_beta - bn_mean * scale                             # (C,)
    w = jnp.transpose(conv_weight[:, 0, :, :], (1, 2, 0)) * scale[None, None, :]

    out = residual_dwconv_bn_nhwc(x, w, shift, max_block_bytes=max_block_bytes)
    return jnp.transpose(out, (0, 3, 1, 2))                       # NHWC -> NCHW


def _reference(x_nchw, conv_weight, bn_gamma, bn_beta, bn_mean, bn_var, eps=1e-5):
    # Pure-JAX reference: depthwise conv (groups=C) + eval-mode BN + residual.
    N, C, H, W = x_nchw.shape
    conv = jax.lax.conv_general_dilated(
        x_nchw, conv_weight, window_strides=(1, 1), padding=((1, 1), (1, 1)),
        dimension_numbers=("NCHW", "OIHW", "NCHW"), feature_group_count=C)
    scale = (bn_gamma / jnp.sqrt(bn_var + eps)).reshape(1, C, 1, 1)
    shift = (bn_beta - bn_mean * bn_gamma / jnp.sqrt(bn_var + eps)).reshape(1, C, 1, 1)
    return x_nchw + conv * scale + shift


if __name__ == "__main__":
    # TODO(synk): training-time stochastic depth (drop > 0) is not implemented;
    # this covers the eval / drop=0.0 path of Residual.forward.
    key = jax.random.PRNGKey(0)

    def run_case(N, C, H, W, case_key, dtype=jnp.float32, tol=1e-4,
                 max_block_bytes=4 << 20):
        k_x, k_w, k_g, k_b, k_m, k_v = jax.random.split(case_key, 6)
        x = jax.random.normal(k_x, (N, C, H, W), dtype=jnp.float32).astype(dtype)
        # Conv2d(C, C, 3, stride=1, pad=1, groups=C, bias=False) -> weight (C,1,3,3)
        conv_weight = 0.1 * jax.random.normal(k_w, (C, 1, 3, 3), dtype=jnp.float32)
        bn_gamma = 1.0 + 0.1 * jax.random.normal(k_g, (C,), dtype=jnp.float32)
        bn_beta = 0.1 * jax.random.normal(k_b, (C,), dtype=jnp.float32)
        bn_mean = 0.05 * jax.random.normal(k_m, (C,), dtype=jnp.float32)
        bn_var = 1.0 + 0.1 * jax.random.uniform(k_v, (C,), dtype=jnp.float32)

        out = residual_dwconv_bn(x, conv_weight, bn_gamma, bn_beta, bn_mean,
                                 bn_var, max_block_bytes=max_block_bytes)
        out = jax.block_until_ready(out)
        ref = _reference(x.astype(jnp.float32), conv_weight, bn_gamma, bn_beta,
                         bn_mean, bn_var)
        assert out.shape == (N, C, H, W)
        assert jnp.allclose(out.astype(jnp.float32), ref, atol=tol, rtol=tol), \
            f"mismatch for case {(N, C, H, W, dtype)}"

    k1, k2, k3, k4 = jax.random.split(key, 4)
    # module demo shape (full-C fallback path, N kept on the grid for megacore)
    run_case(2, 4, 16, 16, k1)
    # lane-dense 128-channel-tile path with N folded into the block
    run_case(2, 256, 8, 8, k2)
    # force H-strip tiling (4 strips) to exercise the cross-strip halo path
    run_case(2, 128, 16, 16, k3, max_block_bytes=32 * 1024)
    # bf16 I/O path (f32 accumulation in-kernel)
    run_case(2, 256, 16, 16, k4, dtype=jnp.bfloat16, tol=6e-2)

    print("KERNEL_OK")
</pallas_src>

<mosaic_0001>
module attributes {stable_mosaic.version = 11 : i64} {
  func.func @_residual_dwconv_bn_kernel(%arg0: i32, %arg1: i32, %arg2: i32, %arg3: memref<1x16x16x4xf32, #tpu.memory_space<vmem>>, %arg4: memref<1x1x16x4xf32, #tpu.memory_space<vmem>>, %arg5: memref<1x1x16x4xf32, #tpu.memory_space<vmem>>, %arg6: memref<3x3x4xf32, #tpu.memory_space<vmem>>, %arg7: memref<1x4xf32, #tpu.memory_space<vmem>>, %arg8: memref<1x16x16x4xf32, #tpu.memory_space<vmem>>, %arg9: memref<1x18x18x4xf32, #tpu.memory_space<vmem>>) attributes {dimension_semantics = [#tpu.dimension_semantics<parallel>, #tpu.dimension_semantics<parallel>, #tpu.dimension_semantics<parallel>], iteration_bounds = array<i64: 2, 1, 1>, scalar_prefetch = 0 : i64, scratch_operands = 1 : i64, tpu.core_type = #tpu.core_type<tc>, window_params = [{transform_indices = @transform_0, window_bounds = array<i64: 1, 16, 16, 4>}, {transform_indices = @transform_1, window_bounds = array<i64: 1, 1, 16, 4>}, {transform_indices = @transform_2, window_bounds = array<i64: 1, 1, 16, 4>}, {transform_indices = @transform_3, window_bounds = array<i64: 3, 3, 4>}, {transform_indices = @transform_4, window_bounds = array<i64: 1, 4>}, {transform_indices = @transform_5, window_bounds = array<i64: 1, 16, 16, 4>}]} {
    %cst = arith.constant 0.000000e+00 : f32
    %0 = vector.broadcast %cst : f32 to vector<1x18x1x4xf32>
    %c0 = arith.constant 0 : index
    %c0_0 = arith.constant 0 : index
    %c0_1 = arith.constant 0 : index
    %c0_2 = arith.constant 0 : index
    %1 = vector.load %arg9[%c0, %c0_0, %c0_1, %c0_2] : memref<1x18x18x4xf32, #tpu.memory_space<vmem>>, vector<1x18x1x4xf32>
    tpu.vector_store %arg9[%c0, %c0_0, %c0_1, %c0_2], %0 {strides = array<i32>} : memref<1x18x18x4xf32, #tpu.memory_space<vmem>>, vector<1x18x1x4xf32>,
    %c0_3 = arith.constant 0 : index
    %c0_4 = arith.constant 0 : index
    %c17 = arith.constant 17 : index
    %c0_5 = arith.constant 0 : index
    %2 = vector.load %arg9[%c0_3, %c0_4, %c17, %c0_5] : memref<1x18x18x4xf32, #tpu.memory_space<vmem>>, vector<1x18x1x4xf32>
    tpu.vector_store %arg9[%c0_3, %c0_4, %c17, %c0_5], %0 {strides = array<i32>} : memref<1x18x18x4xf32, #tpu.memory_space<vmem>>, vector<1x18x1x4xf32>,
    %cst_6 = arith.constant 0.000000e+00 : f32
    %3 = vector.broadcast %cst_6 : f32 to vector<1x1x16x4xf32>
    %c0_i32 = arith.constant 0 : i32
    %4 = arith.cmpi eq, %arg1, %c0_i32 : i32
    %5 = arith.extui %4 : i1 to i32
    %c0_i32_7 = arith.constant 0 : i32
    %6 = arith.cmpi ne, %5, %c0_i32_7 : i32
    scf.if %6 {
      %c0_69 = arith.constant 0 : index
      %c0_70 = arith.constant 0 : index
      %c1_71 = arith.constant 1 : index
      %c0_72 = arith.constant 0 : index
      %89 = vector.load %arg9[%c0_69, %c0_70, %c1_71, %c0_72] : memref<1x18x18x4xf32, #tpu.memory_space<vmem>>, vector<1x1x16x4xf32>
      tpu.vector_store %arg9[%c0_69, %c0_70, %c1_71, %c0_72], %3 {strides = array<i32>} : memref<1x18x18x4xf32, #tpu.memory_space<vmem>>, vector<1x1x16x4xf32>,
    } else {
    }
    %c0_i32_8 = arith.constant 0 : i32
    %7 = arith.cmpi sgt, %arg1, %c0_i32_8 : i32
    %8 = arith.extui %7 : i1 to i32
    %c0_i32_9 = arith.constant 0 : i32
    %9 = arith.cmpi ne, %8, %c0_i32_9 : i32
    scf.if %9 {
      %c0_69 = arith.constant 0 : index
      %c0_70 = arith.constant 0 : index
      %c0_71 = arith.constant 0 : index
      %c0_72 = arith.constant 0 : index
      %89 = vector.load %arg4[%c0_69, %c0_70, %c0_71, %c0_72] : memref<1x1x16x4xf32, #tpu.memory_space<vmem>>, vector<1x1x16x4xf32>
      %c0_73 = arith.constant 0 : index
      %c0_74 = arith.constant 0 : index
      %c1_75 = arith.constant 1 : index
      %c0_76 = arith.constant 0 : index
      %90 = vector.load %arg9[%c0_73, %c0_74, %c1_75, %c0_76] : memref<1x18x18x4xf32, #tpu.memory_space<vmem>>, vector<1x1x16x4xf32>
      tpu.vector_store %arg9[%c0_73, %c0_74, %c1_75, %c0_76], %89 {strides = array<i32>} : memref<1x18x18x4xf32, #tpu.memory_space<vmem>>, vector<1x1x16x4xf32>,
    } else {
    }
    %c0_i32_10 = arith.constant 0 : i32
    %10 = arith.cmpi eq, %arg1, %c0_i32_10 : i32
    %11 = arith.extui %10 : i1 to i32
    %c0_i32_11 = arith.constant 0 : i32
    %12 = arith.cmpi ne, %11, %c0_i32_11 : i32
    scf.if %12 {
      %c0_69 = arith.constant 0 : index
      %c17_70 = arith.constant 17 : index
      %c1_71 = arith.constant 1 : index
      %c0_72 = arith.constant 0 : index
      %89 = vector.load %arg9[%c0_69, %c17_70, %c1_71, %c0_72] : memref<1x18x18x4xf32, #tpu.memory_space<vmem>>, vector<1x1x16x4xf32>
      tpu.vector_store %arg9[%c0_69, %c17_70, %c1_71, %c0_72], %3 {strides = array<i32>} : memref<1x18x18x4xf32, #tpu.memory_space<vmem>>, vector<1x1x16x4xf32>,
    } else {
    }
    %c0_i32_12 = arith.constant 0 : i32
    %13 = arith.cmpi slt, %arg1, %c0_i32_12 : i32
    %14 = arith.extui %13 : i1 to i32
    %c0_i32_13 = arith.constant 0 : i32
    %15 = arith.cmpi ne, %14, %c0_i32_13 : i32
    scf.if %15 {
      %c0_69 = arith.constant 0 : index
      %c0_70 = arith.constant 0 : index
      %c0_71 = arith.constant 0 : index
      %c0_72 = arith.constant 0 : index
      %89 = vector.load %arg5[%c0_69, %c0_70, %c0_71, %c0_72] : memref<1x1x16x4xf32, #tpu.memory_space<vmem>>, vector<1x1x16x4xf32>
      %c0_73 = arith.constant 0 : index
      %c17_74 = arith.constant 17 : index
      %c1_75 = arith.constant 1 : index
      %c0_76 = arith.constant 0 : index
      %90 = vector.load %arg9[%c0_73, %c17_74, %c1_75, %c0_76] : memref<1x18x18x4xf32, #tpu.memory_space<vmem>>, vector<1x1x16x4xf32>
      tpu.vector_store %arg9[%c0_73, %c17_74, %c1_75, %c0_76], %89 {strides = array<i32>} : memref<1x18x18x4xf32, #tpu.memory_space<vmem>>, vector<1x1x16x4xf32>,
    } else {
    }
    %c0_14 = arith.constant 0 : index
    %c0_15 = arith.constant 0 : index
    %c0_16 = arith.constant 0 : index
    %c0_17 = arith.constant 0 : index
    %16 = vector.load %arg3[%c0_14, %c0_15, %c0_16, %c0_17] : memref<1x16x16x4xf32, #tpu.memory_space<vmem>>, vector<1x16x16x4xf32>
    %c0_18 = arith.constant 0 : index
    %c1 = arith.constant 1 : index
    %c1_19 = arith.constant 1 : index
    %c0_20 = arith.constant 0 : index
    %17 = vector.load %arg9[%c0_18, %c1, %c1_19, %c0_20] : memref<1x18x18x4xf32, #tpu.memory_space<vmem>>, vector<1x16x16x4xf32>
    tpu.vector_store %arg9[%c0_18, %c1, %c1_19, %c0_20], %16 {strides = array<i32>} : memref<1x18x18x4xf32, #tpu.memory_space<vmem>>, vector<1x16x16x4xf32>,
    %c0_21 = arith.constant 0 : index
    %c0_22 = arith.constant 0 : index
    %c0_23 = arith.constant 0 : index
    %18 = vector.load %arg6[%c0_21, %c0_22, %c0_23] : memref<3x3x4xf32, #tpu.memory_space<vmem>>, vector<3x3x4xf32>
    %c0_24 = arith.constant 0 : index
    %c0_25 = arith.constant 0 : index
    %19 = vector.load %arg7[%c0_24, %c0_25] : memref<1x4xf32, #tpu.memory_space<vmem>>, vector<1x4xf32>
    %20 = vector.shape_cast %19 : vector<1x4xf32> to vector<4xf32>
    %21 = vector.shape_cast %20 : vector<4xf32> to vector<1x1x1x4xf32>
    %22 = vector.broadcast %21 : vector<1x1x1x4xf32> to vector<1x16x16x4xf32>
    %c0_26 = arith.constant 0 : index
    %c0_27 = arith.constant 0 : index
    %c0_28 = arith.constant 0 : index
    %c0_29 = arith.constant 0 : index
    %23 = vector.load %arg9[%c0_26, %c0_27, %c0_28, %c0_29] : memref<1x18x18x4xf32, #tpu.memory_space<vmem>>, vector<1x16x16x4xf32>
    %24 = vector.extract_strided_slice %18 {offsets = [0, 0, 0], sizes = [1, 1, 4], strides = [1, 1, 1]} : vector<3x3x4xf32> to vector<1x1x4xf32>
    %25 = vector.shape_cast %24 : vector<1x1x4xf32> to vector<4xf32>
    %26 = vector.shape_cast %25 : vector<4xf32> to vector<1x1x1x4xf32>
    %27 = vector.broadcast %26 : vector<1x1x1x4xf32> to vector<1x16x16x4xf32>
    %28 = arith.mulf %23, %27 : vector<1x16x16x4xf32>
    %29 = arith.addf %22, %28 : vector<1x16x16x4xf32>
    %c0_30 = arith.constant 0 : index
    %c1_31 = arith.constant 1 : index
    %c0_32 = arith.constant 0 : index
    %c0_33 = arith.constant 0 : index
    %30 = vector.load %arg9[%c0_30, %c1_31, %c0_32, %c0_33] : memref<1x18x18x4xf32, #tpu.memory_space<vmem>>, vector<1x16x16x4xf32>
    %31 = vector.extract_strided_slice %18 {offsets = [1, 0, 0], sizes = [1, 1, 4], strides = [1, 1, 1]} : vector<3x3x4xf32> to vector<1x1x4xf32>
    %32 = vector.shape_cast %31 : vector<1x1x4xf32> to vector<4xf32>
    %33 = vector.shape_cast %32 : vector<4xf32> to vector<1x1x1x4xf32>
    %34 = vector.broadcast %33 : vector<1x1x1x4xf32> to vector<1x16x16x4xf32>
    %35 = arith.mulf %30, %34 : vector<1x16x16x4xf32>
    %36 = arith.addf %29, %35 : vector<1x16x16x4xf32>
    %c0_34 = arith.constant 0 : index
    %c2 = arith.constant 2 : index
    %c0_35 = arith.constant 0 : index
    %c0_36 = arith.constant 0 : index
    %37 = vector.load %arg9[%c0_34, %c2, %c0_35, %c0_36] : memref<1x18x18x4xf32, #tpu.memory_space<vmem>>, vector<1x16x16x4xf32>
    %38 = vector.extract_strided_slice %18 {offsets = [2, 0, 0], sizes = [1, 1, 4], strides = [1, 1, 1]} : vector<3x3x4xf32> to vector<1x1x4xf32>
    %39 = vector.shape_cast %38 : vector<1x1x4xf32> to vector<4xf32>
    %40 = vector.shape_cast %39 : vector<4xf32> to vector<1x1x1x4xf32>
    %41 = vector.broadcast %40 : vector<1x1x1x4xf32> to vector<1x16x16x4xf32>
    %42 = arith.mulf %37, %41 : vector<1x16x16x4xf32>
    %43 = arith.addf %36, %42 : vector<1x16x16x4xf32>
    %c0_37 = arith.constant 0 : index
    %c0_38 = arith.constant 0 : index
    %c1_39 = arith.constant 1 : index
    %c0_40 = arith.constant 0 : index
    %44 = vector.load %arg9[%c0_37, %c0_38, %c1_39, %c0_40] : memref<1x18x18x4xf32, #tpu.memory_space<vmem>>, vector<1x16x16x4xf32>
    %45 = vector.extract_strided_slice %18 {offsets = [0, 1, 0], sizes = [1, 1, 4], strides = [1, 1, 1]} : vector<3x3x4xf32> to vector<1x1x4xf32>
    %46 = vector.shape_cast %45 : vector<1x1x4xf32> to vector<4xf32>
    %47 = vector.shape_cast %46 : vector<4xf32> to vector<1x1x1x4xf32>
    %48 = vector.broadcast %47 : vector<1x1x1x4xf32> to vector<1x16x16x4xf32>
    %49 = arith.mulf %44, %48 : vector<1x16x16x4xf32>
    %50 = arith.addf %43, %49 : vector<1x16x16x4xf32>
    %c0_41 = arith.constant 0 : index
    %c1_42 = arith.constant 1 : index
    %c1_43 = arith.constant 1 : index
    %c0_44 = arith.constant 0 : index
    %51 = vector.load %arg9[%c0_41, %c1_42, %c1_43, %c0_44] : memref<1x18x18x4xf32, #tpu.memory_space<vmem>>, vector<1x16x16x4xf32>
    %52 = vector.extract_strided_slice %18 {offsets = [1, 1, 0], sizes = [1, 1, 4], strides = [1, 1, 1]} : vector<3x3x4xf32> to vector<1x1x4xf32>
    %53 = vector.shape_cast %52 : vector<1x1x4xf32> to vector<4xf32>
    %54 = vector.shape_cast %53 : vector<4xf32> to vector<1x1x1x4xf32>
    %55 = vector.broadcast %54 : vector<1x1x1x4xf32> to vector<1x16x16x4xf32>
    %56 = arith.mulf %51, %55 : vector<1x16x16x4xf32>
    %57 = arith.addf %50, %56 : vector<1x16x16x4xf32>
    %c0_45 = arith.constant 0 : index
    %c2_46 = arith.constant 2 : index
    %c1_47 = arith.constant 1 : index
    %c0_48 = arith.constant 0 : index
    %58 = vector.load %arg9[%c0_45, %c2_46, %c1_47, %c0_48] : memref<1x18x18x4xf32, #tpu.memory_space<vmem>>, vector<1x16x16x4xf32>
    %59 = vector.extract_strided_slice %18 {offsets = [2, 1, 0], sizes = [1, 1, 4], strides = [1, 1, 1]} : vector<3x3x4xf32> to vector<1x1x4xf32>
    %60 = vector.shape_cast %59 : vector<1x1x4xf32> to vector<4xf32>
    %61 = vector.shape_cast %60 : vector<4xf32> to vector<1x1x1x4xf32>
    %62 = vector.broadcast %61 : vector<1x1x1x4xf32> to vector<1x16x16x4xf32>
    %63 = arith.mulf %58, %62 : vector<1x16x16x4xf32>
    %64 = arith.addf %57, %63 : vector<1x16x16x4xf32>
    %c0_49 = arith.constant 0 : index
    %c0_50 = arith.constant 0 : index
    %c2_51 = arith.constant 2 : index
    %c0_52 = arith.constant 0 : index
    %65 = vector.load %arg9[%c0_49, %c0_50, %c2_51, %c0_52] : memref<1x18x18x4xf32, #tpu.memory_space<vmem>>, vector<1x16x16x4xf32>
    %66 = vector.extract_strided_slice %18 {offsets = [0, 2, 0], sizes = [1, 1, 4], strides = [1, 1, 1]} : vector<3x3x4xf32> to vector<1x1x4xf32>
    %67 = vector.shape_cast %66 : vector<1x1x4xf32> to vector<4xf32>
    %68 = vector.shape_cast %67 : vector<4xf32> to vector<1x1x1x4xf32>
    %69 = vector.broadcast %68 : vector<1x1x1x4xf32> to vector<1x16x16x4xf32>
    %70 = arith.mulf %65, %69 : vector<1x16x16x4xf32>
    %71 = arith.addf %64, %70 : vector<1x16x16x4xf32>
    %c0_53 = arith.constant 0 : index
    %c1_54 = arith.constant 1 : index
    %c2_55 = arith.constant 2 : index
    %c0_56 = arith.constant 0 : index
    %72 = vector.load %arg9[%c0_53, %c1_54, %c2_55, %c0_56] : memref<1x18x18x4xf32, #tpu.memory_space<vmem>>, vector<1x16x16x4xf32>
    %73 = vector.extract_strided_slice %18 {offsets = [1, 2, 0], sizes = [1, 1, 4], strides = [1, 1, 1]} : vector<3x3x4xf32> to vector<1x1x4xf32>
    %74 = vector.shape_cast %73 : vector<1x1x4xf32> to vector<4xf32>
    %75 = vector.shape_cast %74 : vector<4xf32> to vector<1x1x1x4xf32>
    %76 = vector.broadcast %75 : vector<1x1x1x4xf32> to vector<1x16x16x4xf32>
    %77 = arith.mulf %72, %76 : vector<1x16x16x4xf32>
    %78 = arith.addf %71, %77 : vector<1x16x16x4xf32>
    %c0_57 = arith.constant 0 : index
    %c2_58 = arith.constant 2 : index
    %c2_59 = arith.constant 2 : index
    %c0_60 = arith.constant 0 : index
    %79 = vector.load %arg9[%c0_57, %c2_58, %c2_59, %c0_60] : memref<1x18x18x4xf32, #tpu.memory_space<vmem>>, vector<1x16x16x4xf32>
    %80 = vector.extract_strided_slice %18 {offsets = [2, 2, 0], sizes = [1, 1, 4], strides = [1, 1, 1]} : vector<3x3x4xf32> to vector<1x1x4xf32>
    %81 = vector.shape_cast %80 : vector<1x1x4xf32> to vector<4xf32>
    %82 = vector.shape_cast %81 : vector<4xf32> to vector<1x1x1x4xf32>
    %83 = vector.broadcast %82 : vector<1x1x1x4xf32> to vector<1x16x16x4xf32>
    %84 = arith.mulf %79, %83 : vector<1x16x16x4xf32>
    %85 = arith.addf %78, %84 : vector<1x16x16x4xf32>
    %c0_61 = arith.constant 0 : index
    %c0_62 = arith.constant 0 : index
    %c0_63 = arith.constant 0 : index
    %c0_64 = arith.constant 0 : index
    %86 = vector.load %arg3[%c0_61, %c0_62, %c0_63, %c0_64] : memref<1x16x16x4xf32, #tpu.memory_space<vmem>>, vector<1x16x16x4xf32>
    %87 = arith.addf %86, %85 : vector<1x16x16x4xf32>
    %c0_65 = arith.constant 0 : index
    %c0_66 = arith.constant 0 : index
    %c0_67 = arith.constant 0 : index
    %c0_68 = arith.constant 0 : index
    %88 = vector.load %arg8[%c0_65, %c0_66, %c0_67, %c0_68] : memref<1x16x16x4xf32, #tpu.memory_space<vmem>>, vector<1x16x16x4xf32>
    tpu.vector_store %arg8[%c0_65, %c0_66, %c0_67, %c0_68], %87 {strides = array<i32>} : memref<1x16x16x4xf32, #tpu.memory_space<vmem>>, vector<1x16x16x4xf32>,
    return
  }
  func.func @transform_0(%arg0: i32, %arg1: i32, %arg2: i32) -> (i32, i32, i32, i32) {
    %c0_i32 = arith.constant 0 : i32
    %c0_i32_0 = arith.constant 0 : i32
    return %arg0, %arg1, %c0_i32, %arg2 : i32, i32, i32, i32
  }
  func.func @transform_1(%arg0: i32, %arg1: i32, %arg2: i32) -> (i32, i32, i32, i32) {
    %c16_i32 = arith.constant 16 : i32
    %0 = arith.muli %arg1, %c16_i32 : i32
    %c1_i32 = arith.constant 1 : i32
    %1 = arith.subi %0, %c1_i32 : i32
    %c0_i32 = arith.constant 0 : i32
    %2 = arith.maxsi %1, %c0_i32 : i32
    %c0_i32_0 = arith.constant 0 : i32
    %c0_i32_1 = arith.constant 0 : i32
    return %arg0, %2, %c0_i32_0, %arg2 : i32, i32, i32, i32
  }
  func.func @transform_2(%arg0: i32, %arg1: i32, %arg2: i32) -> (i32, i32, i32, i32) {
    %c1_i32 = arith.constant 1 : i32
    %0 = arith.addi %arg1, %c1_i32 : i32
    %c16_i32 = arith.constant 16 : i32
    %1 = arith.muli %0, %c16_i32 : i32
    %c15_i32 = arith.constant 15 : i32
    %2 = arith.minsi %1, %c15_i32 : i32
    %c0_i32 = arith.constant 0 : i32
    %c0_i32_0 = arith.constant 0 : i32
    return %arg0, %2, %c0_i32, %arg2 : i32, i32, i32, i32
  }
  func.func @transform_3(%arg0: i32, %arg1: i32, %arg2: i32) -> (i32, i32, i32) {
    %c0_i32 = arith.constant 0 : i32
    %c0_i32_0 = arith.constant 0 : i32
    %c0_i32_1 = arith.constant 0 : i32
    return %c0_i32, %c0_i32_0, %arg2 : i32, i32, i32
  }
  func.func @transform_4(%arg0: i32, %arg1: i32, %arg2: i32) -> (i32, i32) {
    %c0_i32 = arith.constant 0 : i32
    %c0_i32_0 = arith.constant 0 : i32
    return %c0_i32, %arg2 : i32, i32
  }
  func.func @transform_5(%arg0: i32, %arg1: i32, %arg2: i32) -> (i32, i32, i32, i32) {
    %c0_i32 = arith.constant 0 : i32
    %c0_i32_0 = arith.constant 0 : i32
    return %arg0, %arg1, %c0_i32, %arg2 : i32, i32, i32, i32
  }
}

</mosaic_0001>

<bundles_post_ra>
// kernel: tpu_custom_call.1
= control target key start
LH: loop header
LB: loop body
LE: loop exit
PB: predicated region body
PF: predicated region fallthrough
CT: control target
= control target key end

     0   :  { %s1906_s18 = smov 0   ;;  %s1908_s19 = smov 0   ;;  %s2993_s0 = inlined_call_operand.vmem [shape: f32[2,16,16,4], index: 0, kind: input, shape index: {}]   ;;  %s2994_s1 = inlined_call_operand.vmem [shape: f32[2,16,16,4], index: 1, kind: input, shape index: {}]   ;;  %s2995_s2 = inlined_call_operand.vmem [shape: f32[2,16,16,4], index: 2, kind: input, shape index: {}]   ;;  %s2996_s3 = inlined_call_operand.vmem [shape: f32[3,3,4], index: 3, kind: input, shape index: {}]   ;;  %s2997_s4 = inlined_call_operand.vmem [shape: f32[1,4], index: 4, kind: input, shape index: {}]   ;;  %s2998_s5 = inlined_call_operand.vmem [shape: f32[2,16,16,4], index: 5, kind: output, shape index: {}]  }
   0x1   :  { %s1910_s20 = smov 0  }
   0x2 LB: > { %s34_s1 = sadd.s32 1, %s1869_s19  ;;  %p1808_p0 = scmp.ge.s32.totalorder %s1873_s20, 1  ;;  %s1873_s20 = sphi %s1910_s20, %s15_s20   ;;  %s1869_s19 = sphi %s1908_s19, %s3000_s19   ;;  %s1865_s18 = sphi %s1906_s18, %s2999_s18  }
   0x3   : > { %p36_p1 = scmp.ge.s32.totalorder %s34_s1, 2  ;;  %p314_p2 = scmp.lt.s32.totalorder %s1873_s20, 3 }
   0x5   : > { %s3002_s1 = smov (%p36_p1, %s34_s1), 0  ;;  %p315_p3 = pnand %p1808_p0, %p314_p2 }
   0x6   : > { %vm472_vm0 = vcmask (!%p315_p3), 24576   ;;  %vm513_vm1 = vcmask (!%p315_p3), 31744   ;;  %p398_p4 = scmp.lt.s32.totalorder (!%p315_p3), %s1865_s18, 1  ;;  %v1875_v0 = vmov (!%p315_p3), 0.0   ;;  %v650_v1 = vlaneseq (!%p315_p3)  ;;  %v2024_v12 = vld [vmem:[%s2996_s3] sm:$0x7] (!%p315_p3) }
   0x7   : > { %318 = sbr.rel (%p315_p3) target bundleno = 199 (0xc7), region = 40  ;;  %473 = vst.msk [vmem:[#allocation2] sm:$0x1] (!%p315_p3), %vm472_vm0, %v1875_v0  ;;  %474 = vst.msk [vmem:[#allocation2 + $0x18] sm:$0x1] (!%p315_p3), %vm472_vm0, %v1875_v0 }
   0x8   : > { %475 = vst.msk [vmem:[#allocation2 + $0x30] sm:$0x1] (!%p315_p3), %vm472_vm0, %v1875_v0  ;;  %476 = vst.msk [vmem:[#allocation2 + $0x48] sm:$0x1] (!%p315_p3), %vm472_vm0, %v1875_v0  ;;  %v1980_v2 = vshrl.u32 (!%p315_p3), %v650_v1, 7 }
   0x9   : > { %477 = vst.msk [vmem:[#allocation2 + $0x60] sm:$0x1] (!%p315_p3), %vm472_vm0, %v1875_v0  ;;  %478 = vst.msk [vmem:[#allocation2 + $0x78] sm:$0x1] (!%p315_p3), %vm472_vm0, %v1875_v0  ;;  %v2044_v16 = vld [vmem:[%s2996_s3 + $0x4] sm:$0x7] (!%p315_p3) }
   0xa   : > { %479 = vst.msk [vmem:[#allocation2 + $0x90] sm:$0x1] (!%p315_p3), %vm472_vm0, %v1875_v0  ;;  %480 = vst.msk [vmem:[#allocation2 + $0xa8] sm:$0x1] (!%p315_p3), %vm472_vm0, %v1875_v0  ;;  %v652_v17 = vsub.s32 (!%p315_p3), 0, %v1980_v2  ;;  %v953_v32 = vsub.s32 (!%p315_p3), 1, %v1980_v2 }
   0xb   : > { %481 = vst.msk [vmem:[#allocation2 + $0xc0] sm:$0x1] (!%p315_p3), %vm472_vm0, %v1875_v0  ;;  %482 = vst.msk [vmem:[#allocation2 + $0xd8] sm:$0x1] (!%p315_p3), %vm472_vm0, %v1875_v0  ;;  %v610_v27 = vld [vmem:[%s2996_s3 + $0x8] sm:$0x7] (!%p315_p3) }
   0xc   : > { %483 = vst.msk [vmem:[#allocation2 + $0xf0] sm:$0x1] (!%p315_p3), %vm472_vm0, %v1875_v0  ;;  %484 = vst.msk [vmem:[#allocation2 + $0x108] sm:$0x1] (!%p315_p3), %vm472_vm0, %v1875_v0  ;;  %v2087_v31 = vrot.slane (!%p315_p3), %v2024_v12, %v652_v17  ;;  %v2099_v36 = vld [vmem:[%s2997_s4] ss:$0 sm:$0xff] (!%p315_p3)  ;;  %v2102_v37 = vrot.slane (!%p315_p3), %v2044_v16, %v652_v17  ;;  %v2119_v47 = vrot.slane (!%p315_p3), %v610_v27, %v652_v17 }
   0xd   : > { %485 = vst.msk [vmem:[#allocation2 + $0x120] sm:$0x1] (!%p315_p3), %vm472_vm0, %v1875_v0  ;;  %486 = vst.msk [vmem:[#allocation2 + $0x138] sm:$0x1] (!%p315_p3), %vm472_vm0, %v1875_v0  ;;  %v1253_v41 = vsub.s32 (!%p315_p3), 2, %v1980_v2  ;;  %v2122_v48 = vrot.slane (!%p315_p3), %v2024_v12, %v953_v32  ;;  %v2128_v52 = vrot.slane (!%p315_p3), %v2044_v16, %v953_v32  ;;  %v2130_v53 = vrot.slane (!%p315_p3), %v610_v27, %v953_v32 }
   0xe   : > { %487 = vst.msk [vmem:[#allocation2 + $0x150] sm:$0x1] %vm472_vm0, %v1875_v0  ;;  %488 = vst.msk [vmem:[#allocation2 + $0x168] sm:$0x1] %vm472_vm0, %v1875_v0  ;;  %s3004_s18 = smov (!%p398_p4, %s1865_s18), 1 }
   0xf   : > { %489 = vst.msk [vmem:[#allocation2 + $0x180] sm:$0x1] %vm472_vm0, %v1875_v0  ;;  %490 = vst.msk [vmem:[#allocation2 + $0x198] sm:$0x1] %vm472_vm0, %v1875_v0  ;;  %s1820_s2 = sshll.u32 %s3004_s18, 8  ;;  %v2137_v58 = vrot.slane %v2024_v12, %v1253_v41  ;;  %v2140_v59 = vrot.slane %v2044_v16, %v1253_v41  ;;  %v2142_v63 = vrot.slane %v610_v27, %v1253_v41 }
  0x10   : > { %491 = vst.msk [vmem:[#allocation2 + $0x11] sm:$0x1] %vm472_vm0, %v1875_v0  ;;  %492 = vst.msk [vmem:[#allocation2 + $0x29] sm:$0x1] %vm472_vm0, %v1875_v0  ;;  %s1978_s23 = scalar_lea.vmem %s2993_s0, %s1820_s2  ;;  %s2225_s9 = scalar_lea.vmem %s2998_s5, %s1820_s2 }
  0x11   : > { %493 = vst.msk [vmem:[#allocation2 + $0x41] sm:$0x1] %vm472_vm0, %v1875_v0  ;;  %494 = vst.msk [vmem:[#allocation2 + $0x59] sm:$0x1] %vm472_vm0, %v1875_v0  ;;  %v1983_v3 = vld [vmem:[%s1978_s23] sm:$0xff]  ;;  %v1986_v4 = vld [vmem:[%s1978_s23 + $0x8] sm:$0xff] }
  0x12   : > { %495 = vst.msk [vmem:[#allocation2 + $0x71] sm:$0x1] %vm472_vm0, %v1875_v0  ;;  %496 = vst.msk [vmem:[#allocation2 + $0x89] sm:$0x1] %vm472_vm0, %v1875_v0  ;;  %v1989_v5 = vld [vmem:[%s1978_s23 + $0x10] sm:$0xff]  ;;  %v1998_v6 = vld [vmem:[%s1978_s23 + $0x18] sm:$0xff] }
  0x13   : > { %497 = vst.msk [vmem:[#allocation2 + $0xa1] sm:$0x1] %vm472_vm0, %v1875_v0  ;;  %498 = vst.msk [vmem:[#allocation2 + $0xb9] sm:$0x1] %vm472_vm0, %v1875_v0  ;;  %v2001_v7 = vld [vmem:[%s1978_s23 + $0x20] sm:$0xff]  ;;  %v2004_v8 = vld [vmem:[%s1978_s23 + $0x28] sm:$0xff] }
  0x14   : > { %499 = vst.msk [vmem:[#allocation2 + $0xd1] sm:$0x1] %vm472_vm0, %v1875_v0  ;;  %500 = vst.msk [vmem:[#allocation2 + $0xe9] sm:$0x1] %vm472_vm0, %v1875_v0  ;;  %v2013_v9 = vld [vmem:[%s1978_s23 + $0x30] sm:$0xff]  ;;  %v2016_v10 = vld [vmem:[%s1978_s23 + $0x38] sm:$0xff] }
  0x15   : > { %501 = vst.msk [vmem:[#allocation2 + $0x101] sm:$0x1] %vm472_vm0, %v1875_v0  ;;  %502 = vst.msk [vmem:[#allocation2 + $0x119] sm:$0x1] %vm472_vm0, %v1875_v0  ;;  %v2019_v11 = vld [vmem:[%s1978_s23 + $0x40] sm:$0xff]  ;;  %v2033_v13 = vld [vmem:[%s1978_s23 + $0x48] sm:$0xff] }
  0x16   : > { %503 = vst.msk [vmem:[#allocation2 + $0x131] sm:$0x1] %vm472_vm0, %v1875_v0  ;;  %504 = vst.msk [vmem:[#allocation2 + $0x149] sm:$0x1] %vm472_vm0, %v1875_v0  ;;  %v2036_v14 = vld [vmem:[%s1978_s23 + $0x50] sm:$0xff]  ;;  %v2039_v15 = vld [vmem:[%s1978_s23 + $0x58] sm:$0xff] }
  0x17   : > { %505 = vst.msk [vmem:[#allocation2 + $0x161] sm:$0x1] %vm472_vm0, %v1875_v0  ;;  %506 = vst.msk [vmem:[#allocation2 + $0x179] sm:$0x1] %vm472_vm0, %v1875_v0  ;;  %v2054_v18 = vld [vmem:[%s1978_s23 + $0x60] sm:$0xff]  ;;  %v2057_v19 = vld [vmem:[%s1978_s23 + $0x68] sm:$0xff] }
  0x18   : > { %507 = vst.msk [vmem:[#allocation2 + $0x191] sm:$0x1] %vm472_vm0, %v1875_v0  ;;  %508 = vst.msk [vmem:[#allocation2 + $0x1a9] sm:$0x1] %vm472_vm0, %v1875_v0  ;;  %v2060_v20 = vld [vmem:[%s1978_s23 + $0x70] sm:$0xff]  ;;  %v557_v21 = vld [vmem:[%s1978_s23 + $0x78] sm:$0xff] }
  0x19   : > { %514 = vst.msk [vmem:[#allocation2 + $0x1] sm:$0xff] %vm513_vm1, %v1875_v0  ;;  %515 = vst.msk [vmem:[#allocation2 + $0x9] sm:$0xff] %vm513_vm1, %v1875_v0  ;;  %v558_v22 = vld [vmem:[%s1978_s23 + $0x80] sm:$0xff]  ;;  %v559_v23 = vld [vmem:[%s1978_s23 + $0x88] sm:$0xff] }
  0x1a   : > { %530 = vst.msk [vmem:[#allocation2 + $0x199] sm:$0xff] %vm513_vm1, %v1875_v0  ;;  %531 = vst.msk [vmem:[#allocation2 + $0x1a1] sm:$0xff] %vm513_vm1, %v1875_v0  ;;  %v560_v24 = vld [vmem:[%s1978_s23 + $0x90] sm:$0xff]  ;;  %v561_v25 = vld [vmem:[%s1978_s23 + $0x98] sm:$0xff] }
  0x1b   : > { %576 = vst.msk [vmem:[#allocation2 + $0x19] sm:$0xff] %vm513_vm1, %v1983_v3  ;;  %577 = vst.msk [vmem:[#allocation2 + $0x21] sm:$0xff] %vm513_vm1, %v1986_v4  ;;  %v562_v26 = vld [vmem:[%s1978_s23 + $0xa0] sm:$0xff]  ;;  %v563_v28 = vld [vmem:[%s1978_s23 + $0xa8] sm:$0xff] }
  0x1c   : > { %578 = vst.msk [vmem:[#allocation2 + $0x31] sm:$0xff] %vm513_vm1, %v1989_v5  ;;  %579 = vst.msk [vmem:[#allocation2 + $0x39] sm:$0xff] %vm513_vm1, %v1998_v6  ;;  %v564_v29 = vld [vmem:[%s1978_s23 + $0xb0] sm:$0xff]  ;;  %v565_v30 = vld [vmem:[%s1978_s23 + $0xb8] sm:$0xff] }
  0x1d   : > { %580 = vst.msk [vmem:[#allocation2 + $0x49] sm:$0xff] %vm513_vm1, %v2001_v7  ;;  %581 = vst.msk [vmem:[#allocation2 + $0x51] sm:$0xff] %vm513_vm1, %v2004_v8  ;;  %v566_v33 = vld [vmem:[%s1978_s23 + $0xc0] sm:$0xff]  ;;  %v567_v34 = vld [vmem:[%s1978_s23 + $0xc8] sm:$0xff] }
  0x1e   : > { %582 = vst.msk [vmem:[#allocation2 + $0x61] sm:$0xff] %vm513_vm1, %v2013_v9  ;;  %583 = vst.msk [vmem:[#allocation2 + $0x69] sm:$0xff] %vm513_vm1, %v2016_v10  ;;  %v568_v35 = vld [vmem:[%s1978_s23 + $0xd0] sm:$0xff]  ;;  %v569_v38 = vld [vmem:[%s1978_s23 + $0xd8] sm:$0xff] }
  0x1f   : > { %584 = vst.msk [vmem:[#allocation2 + $0x79] sm:$0xff] %vm513_vm1, %v2019_v11  ;;  %585 = vst.msk [vmem:[#allocation2 + $0x81] sm:$0xff] %vm513_vm1, %v2033_v13  ;;  %v570_v39 = vld [vmem:[%s1978_s23 + $0xe0] sm:$0xff]  ;;  %v571_v40 = vld [vmem:[%s1978_s23 + $0xe8] sm:$0xff] }
  0x20   : > { %586 = vst.msk [vmem:[#allocation2 + $0x91] sm:$0xff] %vm513_vm1, %v2036_v14  ;;  %587 = vst.msk [vmem:[#allocation2 + $0x99] sm:$0xff] %vm513_vm1, %v2039_v15  ;;  %v572_v42 = vld [vmem:[%s1978_s23 + $0xf0] sm:$0xff]  ;;  %v573_v43 = vld [vmem:[%s1978_s23 + $0xf8] sm:$0xff] }
  0x21   : > { %588 = vst.msk [vmem:[#allocation2 + $0xa9] sm:$0xff] %vm513_vm1, %v2054_v18  ;;  %589 = vst.msk [vmem:[#allocation2 + $0xb1] sm:$0xff] %vm513_vm1, %v2057_v19  ;;  %v618_v44 = vld [vmem:[#allocation2] sm:$0xff]  ;;  %v619_v60 = vld [vmem:[#allocation2 + $0x8] sm:$0xff] }
  0x22   : > { %590 = vst.msk [vmem:[#allocation2 + $0xc1] sm:$0xff] %vm513_vm1, %v2060_v20  ;;  %591 = vst.msk [vmem:[#allocation2 + $0xc9] sm:$0xff] %vm513_vm1, %v557_v21  ;;  %v654_v45 = vmul.f32 %v2087_v31, %v618_v44  ;;  %v718_v46 = vld [vmem:[#allocation2 + $0x18] sm:$0xff]  ;;  %v919_v51 = vld [vmem:[#allocation2 + $0x1] sm:$0xff]  ;;  %v655_v0 = vmul.f32 %v2087_v31, %v619_v60 }
  0x23   : > { %592 = vst.msk [vmem:[#allocation2 + $0xd9] sm:$0xff] %vm513_vm1, %v558_v22  ;;  %593 = vst.msk [vmem:[#allocation2 + $0xe1] sm:$0xff] %vm513_vm1, %v559_v23  ;;  %v754_v49 = vmul.f32 %v2102_v37, %v718_v46  ;;  %v2125_v50 = vld [vmem:[#allocation2 + $0x30] sm:$0xff]  ;;  %v656_v54 = vmul.f32 %v718_v46, %v2087_v31  ;;  %v1019_v56 = vld [vmem:[#allocation2 + $0x19] sm:$0xff] }
  0x24   : > { %594 = vst.msk [vmem:[#allocation2 + $0xf1] sm:$0xff] %vm513_vm1, %v560_v24  ;;  %595 = vst.msk [vmem:[#allocation2 + $0xf9] sm:$0xff] %vm513_vm1, %v561_v25  ;;  %v686_v55 = vadd.f32 %v2099_v36, %v654_v45  ;;  %v2134_v57 = vld [vmem:[#allocation2 + $0x31] sm:$0xff]  ;;  %v1219_v61 = vld [vmem:[#allocation2 + $0x2] sm:$0xff]  ;;  %v855_v17 = vmul.f32 %v2119_v47, %v2125_v50  ;;  %v955_v24 = vmul.f32 %v2122_v48, %v919_v51 }
  0x25   : > { %596 = vst.msk [vmem:[#allocation2 + $0x109] sm:$0xff] %vm513_vm1, %v562_v26  ;;  %597 = vst.msk [vmem:[#allocation2 + $0x111] sm:$0xff] %vm513_vm1, %v563_v28  ;;  %v1319_v62 = vld [vmem:[#allocation2 + $0x1a] sm:$0xff]  ;;  %v2147_v21 = vld [vmem:[#allocation2 + $0x32] sm:$0xff]  ;;  %v688_v23 = vadd.f32 %v2099_v36, %v656_v54  ;;  %v1055_v25 = vmul.f32 %v2128_v52, %v1019_v56  ;;  %v1155_v26 = vmul.f32 %v2130_v53, %v2134_v57 }
  0x26   : > { %598 = vst.msk [vmem:[#allocation2 + $0x121] sm:$0xff] %vm513_vm1, %v564_v29  ;;  %599 = vst.msk [vmem:[#allocation2 + $0x129] sm:$0xff] %vm513_vm1, %v565_v30  ;;  %v719_v1 = vld [vmem:[#allocation2 + $0x20] sm:$0xff]  ;;  %v786_v2 = vadd.f32 %v754_v49, %v686_v55  ;;  %v2150_v22 = vld [vmem:[#allocation2 + $0x38] sm:$0xff]  ;;  %v687_v27 = vadd.f32 %v2099_v36, %v655_v0  ;;  %v1255_v32 = vmul.f32 %v2137_v58, %v1219_v61 }
  0x27   : > { %600 = vst.msk [vmem:[#allocation2 + $0x139] sm:$0xff] %vm513_vm1, %v566_v33  ;;  %601 = vst.msk [vmem:[#allocation2 + $0x141] sm:$0xff] %vm513_vm1, %v567_v34  ;;  %v755_v12 = vmul.f32 %v2102_v37, %v719_v1  ;;  %v920_v16 = vld [vmem:[#allocation2 + $0x9] sm:$0xff]  ;;  %v1020_v28 = vld [vmem:[#allocation2 + $0x21] sm:$0xff]  ;;  %v1355_v33 = vmul.f32 %v2140_v59, %v1319_v62  ;;  %v856_v41 = vmul.f32 %v2119_v47, %v2150_v22 }
  0x28   : > { %602 = vst.msk [vmem:[#allocation2 + $0x151] sm:$0xff] %vm513_vm1, %v568_v35  ;;  %603 = vst.msk [vmem:[#allocation2 + $0x159] sm:$0xff] %vm513_vm1, %v569_v38  ;;  %v2158_v29 = vld [vmem:[#allocation2 + $0x48] sm:$0xff]  ;;  %v887_v30 = vadd.f32 %v855_v17, %v786_v2  ;;  %v2162_v34 = vld [vmem:[#allocation2 + $0x39] sm:$0xff]  ;;  %v756_v38 = vmul.f32 %v2125_v50, %v2102_v37  ;;  %v1056_v45 = vmul.f32 %v2128_v52, %v1020_v28 }
  0x29   : > { %604 = vst.msk [vmem:[#allocation2 + $0x169] sm:$0xff] %vm513_vm1, %v570_v39  ;;  %605 = vst.msk [vmem:[#allocation2 + $0x171] sm:$0xff] %vm513_vm1, %v571_v40  ;;  %v1220_v35 = vld [vmem:[#allocation2 + $0xa] sm:$0xff]  ;;  %v1455_v39 = vmul.f32 %v2142_v63, %v2147_v21  ;;  %v787_v40 = vadd.f32 %v755_v12, %v687_v27  ;;  %v2172_v46 = vld [vmem:[#allocation2 + $0x3a] sm:$0xff]  ;;  %v857_v51 = vmul.f32 %v2119_v47, %v2158_v29 }
  0x2a   : > { %606 = vst.msk [vmem:[#allocation2 + $0x181] sm:$0xff] %vm513_vm1, %v572_v42  ;;  %607 = vst.msk [vmem:[#allocation2 + $0x189] sm:$0xff] %vm513_vm1, %v573_v43  ;;  %v956_v42 = vmul.f32 %v2122_v48, %v920_v16  ;;  %v1320_v43 = vld [vmem:[#allocation2 + $0x22] sm:$0xff]  ;;  %v987_v44 = vadd.f32 %v955_v24, %v887_v30  ;;  %v788_v49 = vadd.f32 %v756_v38, %v688_v23  ;;  %v2184_v23 = vld [vmem:[#allocation2 + $0x50] sm:$0xff] }
  0x2b   : > { %v888_v54 = vadd.f32 %v856_v41, %v787_v40  ;;  %v1156_v55 = vmul.f32 %v2130_v53, %v2162_v34  ;;  %v1256_v60 = vmul.f32 %v2137_v58, %v1220_v35  ;;  %v2179_v61 = vld [vmem:[#allocation2 + $0x49] sm:$0xff]  ;;  %v657_v0 = vmul.f32 %v719_v1, %v2087_v31 }
  0x2c   : > { %v1087_v2 = vadd.f32 %v1055_v25, %v987_v44  ;;  %v1356_v17 = vmul.f32 %v2140_v59, %v1320_v43  ;;  %v889_v12 = vadd.f32 %v857_v51, %v788_v49  ;;  %v957_v16 = vmul.f32 %v1019_v56, %v2122_v48  ;;  %v2195_v56 = vld [vmem:[#allocation2 + $0x4a] sm:$0xff] }
  0x2d   : > { %v988_v24 = vadd.f32 %v956_v42, %v888_v54  ;;  %v1456_v27 = vmul.f32 %v2142_v63, %v2172_v46  ;;  %v689_v30 = vadd.f32 %v2099_v36, %v657_v0  ;;  %v757_v35 = vmul.f32 %v2150_v22, %v2102_v37  ;;  %v2202_v0 = vld [vmem:[#allocation2 + $0x51] sm:$0xff] }
  0x2e   : > { %v1187_v38 = vadd.f32 %v1155_v26, %v1087_v2  ;;  %v989_v40 = vadd.f32 %v957_v16, %v889_v12  ;;  %v1057_v1 = vmul.f32 %v2134_v57, %v2128_v52  ;;  %v1157_v25 = vmul.f32 %v2130_v53, %v2179_v61 }
  0x2f   : > { %v1088_v41 = vadd.f32 %v1056_v45, %v988_v24  ;;  %v1257_v42 = vmul.f32 %v1319_v62, %v2137_v58  ;;  %v789_v44 = vadd.f32 %v757_v35, %v689_v30  ;;  %v858_v49 = vmul.f32 %v2119_v47, %v2184_v23  ;;  %v2209_v24 = vld [vmem:[#allocation2 + $0x60] sm:$0xff] }
  0x30   : > { %v1287_v51 = vadd.f32 %v1255_v32, %v1187_v38  ;;  %v1089_v54 = vadd.f32 %v1057_v1, %v989_v40  ;;  %v1357_v26 = vmul.f32 %v2147_v21, %v2140_v59  ;;  %v658_v2 = vmul.f32 %v2125_v50, %v2087_v31 }
  0x31   : > { %v1188_v12 = vadd.f32 %v1156_v55, %v1088_v41  ;;  %v1457_v45 = vmul.f32 %v2142_v63, %v2195_v56  ;;  %v890_v62 = vadd.f32 %v858_v49, %v789_v44  ;;  %v958_v16 = vmul.f32 %v1020_v28, %v2122_v48 }
  0x32   : > { %v1387_v32 = vadd.f32 %v1355_v33, %v1287_v51  ;;  %v1189_v30 = vadd.f32 %v1157_v25, %v1089_v54  ;;  %v690_v35 = vadd.f32 %v2099_v36, %v658_v2  ;;  %v758_v38 = vmul.f32 %v2158_v29, %v2102_v37 }
  0x33   : > { %v1288_v40 = vadd.f32 %v1256_v60, %v1188_v12  ;;  %v990_v1 = vadd.f32 %v958_v16, %v890_v62  ;;  %v1058_v50 = vmul.f32 %v2162_v34, %v2128_v52  ;;  %v1158_v55 = vmul.f32 %v2130_v53, %v2202_v0  ;;  %v2233_v12 = vld [vmem:[#allocation2 + $0x68] sm:$0xff] }
  0x34   : > { %v1487_v41 = vadd.f32 %v1455_v39, %v1387_v32  ;;  %v1289_v44 = vadd.f32 %v1257_v42, %v1189_v30  ;;  %v790_v28 = vadd.f32 %v758_v38, %v690_v35  ;;  %v859_v33 = vmul.f32 %v2119_v47, %v2209_v24  ;;  %v2235_v32 = vld [vmem:[#allocation2 + $0x52] sm:$0xff] }
  0x35   : > { %v1388_v60 = vadd.f32 %v1356_v17, %v1288_v40  ;;  %v1090_v25 = vadd.f32 %v1058_v50, %v990_v1  ;;  %v1258_v49 = vmul.f32 %v1320_v43, %v2137_v58  ;;  %v659_v51 = vmul.f32 %v2150_v22, %v2087_v31  ;;  %v2237_v17 = vld [vmem:[#allocation2 + $0x61] sm:$0xff] }
  0x36   : > { %v1551_v39 = vadd.f32 %v1487_v41, %v1983_v3  ;;  %v1389_v42 = vadd.f32 %v1357_v26, %v1289_v44  ;;  %v891_v54 = vadd.f32 %v859_v33, %v790_v28  ;;  %v959_v2 = vmul.f32 %v2134_v57, %v2122_v48  ;;  %v2258_v44 = vld [vmem:[#allocation2 + $0x62] sm:$0xff] }
  0x37   : > { %v1488_v62 = vadd.f32 %v1456_v27, %v1388_v60  ;;  %v1190_v16 = vadd.f32 %v1158_v55, %v1090_v25  ;;  %v691_v43 = vadd.f32 %v2099_v36, %v659_v51  ;;  %v759_v22 = vmul.f32 %v2184_v23, %v2102_v37  ;;  %v2262_v33 = vld [vmem:[#allocation2 + $0x69] sm:$0xff]  ;;  %v2272_v51 = vld [vmem:[#allocation2 + $0x78] sm:$0xff] }
  0x38   : > { %1583 = vst.msk [vmem:[%s2225_s9] sm:$0xff] %vm513_vm1, %v1551_v39  ;;  %v1489_v3 = vadd.f32 %v1457_v45, %v1389_v42  ;;  %v1358_v57 = vmul.f32 %v2172_v46, %v2140_v59  ;;  %v991_v26 = vadd.f32 %v959_v2, %v891_v54  ;;  %v1059_v27 = vmul.f32 %v2179_v61, %v2128_v52 }
  0x39   : > { %v1552_v30 = vadd.f32 %v1488_v62, %v1986_v4  ;;  %v1290_v35 = vadd.f32 %v1258_v49, %v1190_v16  ;;  %v791_v38 = vadd.f32 %v759_v22, %v691_v43  ;;  %v860_v40 = vmul.f32 %v2119_v47, %v2233_v12  ;;  %v2283_v16 = vld [vmem:[#allocation2 + $0x6a] sm:$0xff] }
  0x3a   : > { %v1553_v1 = vadd.f32 %v1489_v3, %v1989_v5  ;;  %v1458_v45 = vmul.f32 %v2142_v63, %v2235_v32  ;;  %v1091_v50 = vadd.f32 %v1059_v27, %v991_v26  ;;  %v1159_v55 = vmul.f32 %v2130_v53, %v2237_v17 }
  0x3b   : > { %1584 = vst.msk [vmem:[%s2225_s9 + $0x8] sm:$0xff] %vm513_vm1, %v1552_v30  ;;  %v1390_v41 = vadd.f32 %v1358_v57, %v1290_v35  ;;  %v892_v4 = vadd.f32 %v860_v40, %v791_v38  ;;  %v960_v28 = vmul.f32 %v2162_v34, %v2122_v48  ;;  %v660_v5 = vmul.f32 %v2158_v29, %v2087_v31  ;;  %v2292_v35 = vld [vmem:[#allocation2 + $0x79] sm:$0xff] }
  0x3c   : > { %1585 = vst.msk [vmem:[%s2225_s9 + $0x10] sm:$0xff] %vm513_vm1, %v1553_v1  ;;  %v1191_v60 = vadd.f32 %v1159_v55, %v1091_v50  ;;  %v1259_v25 = vmul.f32 %v2147_v21, %v2137_v58  ;;  %v1060_v49 = vmul.f32 %v2202_v0, %v2128_v52  ;;  %v760_v54 = vmul.f32 %v2209_v24, %v2102_v37  ;;  %v2302_v50 = vld [vmem:[#allocation2 + $0x80] sm:$0xff] }
  0x3d   : > { %v1490_v39 = vadd.f32 %v1458_v45, %v1390_v41  ;;  %v992_v42 = vadd.f32 %v960_v28, %v892_v4  ;;  %v692_v34 = vadd.f32 %v2099_v36, %v660_v5  ;;  %v1359_v2 = vmul.f32 %v2195_v56, %v2140_v59  ;;  %v2306_v41 = vld [vmem:[#allocation2 + $0x7a] sm:$0xff] }
  0x3e   : > { %v1291_v29 = vadd.f32 %v1259_v25, %v1191_v60  ;;  %v1459_v21 = vmul.f32 %v2142_v63, %v2258_v44  ;;  %v1160_v62 = vmul.f32 %v2130_v53, %v2262_v33  ;;  %v861_v57 = vmul.f32 %v2119_v47, %v2272_v51 }
  0x3f   : > { %v1554_v43 = vadd.f32 %v1490_v39, %v1998_v6  ;;  %v1092_v22 = vadd.f32 %v1060_v49, %v992_v42  ;;  %v792_v3 = vadd.f32 %v760_v54, %v692_v34  ;;  %v1260_v27 = vmul.f32 %v2172_v46, %v2137_v58  ;;  %v2318_v42 = vld [vmem:[#allocation2 + $0x81] sm:$0xff] }
  0x40   : > { %v1391_v26 = vadd.f32 %v1359_v2, %v1291_v29  ;;  %v1360_v30 = vmul.f32 %v2235_v32, %v2140_v59  ;;  %v661_v38 = vmul.f32 %v2184_v23, %v2087_v31  ;;  %v1460_v40 = vmul.f32 %v2142_v63, %v2283_v16 }
  0x41   : > { %1586 = vst.msk [vmem:[%s2225_s9 + $0x18] sm:$0xff] %vm513_vm1, %v1554_v43  ;;  %v1192_v6 = vadd.f32 %v1160_v62, %v1092_v22  ;;  %v893_v1 = vadd.f32 %v861_v57, %v792_v3  ;;  %v961_v45 = vmul.f32 %v2179_v61, %v2122_v48  ;;  %v1061_v55 = vmul.f32 %v2237_v17, %v2128_v52 }
  0x42   : > { %v1491_v46 = vadd.f32 %v1459_v21, %v1391_v26  ;;  %v693_v23 = vadd.f32 %v2099_v36, %v661_v38  ;;  %v761_v4 = vmul.f32 %v2233_v12, %v2102_v37  ;;  %v1161_v60 = vmul.f32 %v2130_v53, %v2292_v35 }
  0x43   : > { %v1292_v28 = vadd.f32 %v1260_v27, %v1192_v6  ;;  %v993_v5 = vadd.f32 %v961_v45, %v893_v1  ;;  %v1261_v61 = vmul.f32 %v2195_v56, %v2137_v58  ;;  %v862_v39 = vmul.f32 %v2119_v47, %v2302_v50  ;;  %v2326_v56 = vld [vmem:[#allocation2 + $0x90] sm:$0xff] }
  0x44   : > { %v1555_v25 = vadd.f32 %v1491_v46, %v2001_v7  ;;  %v793_v49 = vadd.f32 %v761_v4, %v693_v23  ;;  %v662_v34 = vmul.f32 %v2209_v24, %v2087_v31  ;;  %v1361_v2 = vmul.f32 %v2258_v44, %v2140_v59 }
  0x45   : > { %v1392_v54 = vadd.f32 %v1360_v30, %v1292_v28  ;;  %v1093_v29 = vadd.f32 %v1061_v55, %v993_v5  ;;  %v1461_v21 = vmul.f32 %v2142_v63, %v2306_v41  ;;  %v962_v62 = vmul.f32 %v2202_v0, %v2122_v48  ;;  %v2339_v30 = vld [vmem:[#allocation2 + $0x82] sm:$0xff]  ;;  %v2350_v55 = vld [vmem:[#allocation2 + $0x98] sm:$0xff] }
  0x46   : > { %1587 = vst.msk [vmem:[%s2225_s9 + $0x20] sm:$0xff] %vm513_vm1, %v1555_v25  ;;  %v894_v7 = vadd.f32 %v862_v39, %v793_v49  ;;  %v694_v43 = vadd.f32 %v2099_v36, %v662_v34  ;;  %v762_v24 = vmul.f32 %v2272_v51, %v2102_v37  ;;  %v1062_v57 = vmul.f32 %v2262_v33, %v2128_v52  ;;  %v2352_v28 = vld [vmem:[#allocation2 + $0x91] sm:$0xff] }
  0x47   : > { %v1492_v22 = vadd.f32 %v1460_v40, %v1392_v54  ;;  %v1193_v3 = vadd.f32 %v1161_v60, %v1093_v29  ;;  %v1162_v26 = vmul.f32 %v2130_v53, %v2318_v42  ;;  %v863_v0 = vmul.f32 %v2119_v47, %v2326_v56 }
  0x48   : > { %v994_v27 = vadd.f32 %v962_v62, %v894_v7  ;;  %v794_v38 = vadd.f32 %v762_v24, %v694_v43  ;;  %v663_v6 = vmul.f32 %v2233_v12, %v2087_v31  ;;  %v1262_v45 = vmul.f32 %v2235_v32, %v2137_v58  ;;  %v2373_v43 = vld [vmem:[#allocation2 + $0x92] sm:$0xff] }
  0x49   : > { %v1556_v40 = vadd.f32 %v1492_v22, %v2004_v8  ;;  %v1293_v1 = vadd.f32 %v1261_v61, %v1193_v3  ;;  %v963_v46 = vmul.f32 %v2237_v17, %v2122_v48  ;;  %v763_v12 = vmul.f32 %v2302_v50, %v2102_v37  ;;  %v2377_v3 = vld [vmem:[#allocation2 + $0x99] sm:$0xff] }
  0x4a   : > { %v1094_v23 = vadd.f32 %v1062_v57, %v994_v27  ;;  %v895_v4 = vadd.f32 %v863_v0, %v794_v38  ;;  %v695_v5 = vadd.f32 %v2099_v36, %v663_v6  ;;  %v1362_v32 = vmul.f32 %v2283_v16, %v2140_v59 }
  0x4b   : > { %1588 = vst.msk [vmem:[%s2225_s9 + $0x28] sm:$0xff] %vm513_vm1, %v1556_v40  ;;  %v1393_v8 = vadd.f32 %v1361_v2, %v1293_v1  ;;  %v1462_v17 = vmul.f32 %v2142_v63, %v2339_v30  ;;  %v1063_v60 = vmul.f32 %v2292_v35, %v2128_v52  ;;  %v864_v39 = vmul.f32 %v2119_v47, %v2350_v55 }
  0x4c   : > { %v1194_v61 = vadd.f32 %v1162_v26, %v1094_v23  ;;  %v995_v25 = vadd.f32 %v963_v46, %v895_v4  ;;  %v795_v49 = vadd.f32 %v763_v12, %v695_v5  ;;  %v1163_v54 = vmul.f32 %v2130_v53, %v2352_v28  ;;  %v2397_v4 = vld [vmem:[#allocation2 + $0x9a] sm:$0xff] }
  0x4d   : > { %v1493_v34 = vadd.f32 %v1461_v21, %v1393_v8  ;;  %v1263_v29 = vmul.f32 %v2258_v44, %v2137_v58  ;;  %v664_v2 = vmul.f32 %v2272_v51, %v2087_v31  ;;  %v964_v22 = vmul.f32 %v2262_v33, %v2122_v48  ;;  %v2379_v21 = vld [vmem:[#allocation2 + $0xa8] sm:$0xff] }
  0x4e   : > { %v1294_v7 = vadd.f32 %v1262_v45, %v1194_v61  ;;  %v1095_v62 = vadd.f32 %v1063_v60, %v995_v25  ;;  %v896_v24 = vadd.f32 %v864_v39, %v795_v49  ;;  %v1363_v44 = vmul.f32 %v2306_v41, %v2140_v59  ;;  %v2407_v61 = vld [vmem:[#allocation2 + $0xb0] sm:$0xff] }
  0x4f   : > { %v1557_v57 = vadd.f32 %v1493_v34, %v2013_v9  ;;  %v696_v51 = vadd.f32 %v2099_v36, %v664_v2  ;;  %v764_v26 = vmul.f32 %v2326_v56, %v2102_v37  ;;  %v1064_v33 = vmul.f32 %v2318_v42, %v2128_v52  ;;  %v2410_v39 = vld [vmem:[#allocation2 + $0xa9] sm:$0xff] }
  0x50   : > { %v1394_v27 = vadd.f32 %v1362_v32, %v1294_v7  ;;  %v1195_v38 = vadd.f32 %v1163_v54, %v1095_v62  ;;  %v996_v0 = vadd.f32 %v964_v22, %v896_v24  ;;  %v1463_v6 = vmul.f32 %v2142_v63, %v2373_v43 }
  0x51   : > { %1589 = vst.msk [vmem:[%s2225_s9 + $0x30] sm:$0xff] %vm513_vm1, %v1557_v57  ;;  %v1164_v9 = vmul.f32 %v2130_v53, %v2377_v3  ;;  %v796_v40 = vadd.f32 %v764_v26, %v696_v51  ;;  %v865_v1 = vmul.f32 %v2119_v47, %v2379_v21  ;;  %v665_v5 = vmul.f32 %v2302_v50, %v2087_v31  ;;  %v2427_v57 = vld [vmem:[#allocation2 + $0xaa] sm:$0xff] }
  0x52   : > { %v1494_v45 = vadd.f32 %v1462_v17, %v1394_v27  ;;  %v1295_v46 = vadd.f32 %v1263_v29, %v1195_v38  ;;  %v1096_v23 = vadd.f32 %v1064_v33, %v996_v0  ;;  %v1264_v12 = vmul.f32 %v2283_v16, %v2137_v58  ;;  %v2434_v0 = vld [vmem:[#allocation2 + $0xb1] sm:$0xff]  ;;  %v2436_v33 = vld [vmem:[#allocation2 + $0xc0] sm:$0xff] }
  0x53   : > { %v897_v8 = vadd.f32 %v865_v1, %v796_v40  ;;  %v965_v32 = vmul.f32 %v2292_v35, %v2122_v48  ;;  %v765_v60 = vmul.f32 %v2350_v55, %v2102_v37  ;;  %v697_v50 = vadd.f32 %v2099_v36, %v665_v5 }
  0x54   : > { %v1558_v17 = vadd.f32 %v1494_v45, %v2016_v10  ;;  %v1395_v25 = vadd.f32 %v1363_v44, %v1295_v46  ;;  %v1196_v49 = vadd.f32 %v1164_v9, %v1096_v23  ;;  %v1364_v16 = vmul.f32 %v2339_v30, %v2140_v59  ;;  %v2451_v23 = vld [vmem:[#allocation2 + $0xb2] sm:$0xff] }
  0x55   : > { %v1464_v34 = vmul.f32 %v2142_v63, %v2397_v4  ;;  %v997_v35 = vadd.f32 %v965_v32, %v897_v8  ;;  %v1065_v54 = vmul.f32 %v2352_v28, %v2128_v52  ;;  %v797_v2 = vadd.f32 %v765_v60, %v697_v50 }
  0x56   : > { %1590 = vst.msk [vmem:[%s2225_s9 + $0x38] sm:$0xff] %vm513_vm1, %v1558_v17  ;;  %v1495_v29 = vadd.f32 %v1463_v6, %v1395_v25  ;;  %v1296_v10 = vadd.f32 %v1264_v12, %v1196_v49  ;;  %v866_v7 = vmul.f32 %v2119_v47, %v2407_v61  ;;  %v1165_v24 = vmul.f32 %v2130_v53, %v2410_v39  ;;  %v2458_v17 = vld [vmem:[#allocation2 + $0xc1] sm:$0xff] }
  0x57   : > { %v1097_v62 = vadd.f32 %v1065_v54, %v997_v35  ;;  %v1265_v22 = vmul.f32 %v2306_v41, %v2137_v58  ;;  %v666_v44 = vmul.f32 %v2326_v56, %v2087_v31  ;;  %v966_v38 = vmul.f32 %v2318_v42, %v2122_v48  ;;  %v2466_v35 = vld [vmem:[#allocation2 + $0xc8] sm:$0xff] }
  0x58   : > { %v1559_v51 = vadd.f32 %v1495_v29, %v2019_v11  ;;  %v1396_v26 = vadd.f32 %v1364_v16, %v1296_v10  ;;  %v898_v27 = vadd.f32 %v866_v7, %v797_v2  ;;  %v1365_v41 = vmul.f32 %v2373_v43, %v2140_v59 }
  0x59   : > { %v1197_v6 = vadd.f32 %v1165_v24, %v1097_v62  ;;  %v698_v9 = vadd.f32 %v2099_v36, %v666_v44  ;;  %v766_v56 = vmul.f32 %v2379_v21, %v2102_v37  ;;  %v1465_v40 = vmul.f32 %v2142_v63, %v2427_v57  ;;  %v2479_v62 = vld [vmem:[#allocation2 + $0xc2] sm:$0xff] }
  0x5a   : > { %1591 = vst.msk [vmem:[%s2225_s9 + $0x40] sm:$0xff] %vm513_vm1, %v1559_v51  ;;  %v1496_v11 = vadd.f32 %v1464_v34, %v1396_v26  ;;  %v998_v42 = vadd.f32 %v966_v38, %v898_v27  ;;  %v1066_v1 = vmul.f32 %v2377_v3, %v2128_v52  ;;  %v1166_v46 = vmul.f32 %v2130_v53, %v2434_v0 }
  0x5b   : > { %v1297_v45 = vadd.f32 %v1265_v22, %v1197_v6  ;;  %v798_v5 = vadd.f32 %v766_v56, %v698_v9  ;;  %v867_v12 = vmul.f32 %v2119_v47, %v2436_v33  ;;  %v1266_v60 = vmul.f32 %v2339_v30, %v2137_v58  ;;  %v2490_v6 = vld [vmem:[#allocation2 + $0xd8] sm:$0xff]  ;;  %v2492_v56 = vld [vmem:[#allocation2 + $0xc9] sm:$0xff] }
  0x5c   : > { %v1560_v8 = vadd.f32 %v1496_v11, %v2033_v13  ;;  %v1098_v32 = vadd.f32 %v1066_v1, %v998_v42  ;;  %v667_v25 = vmul.f32 %v2350_v55, %v2087_v31  ;;  %v1366_v50 = vmul.f32 %v2397_v4, %v2140_v59 }
  0x5d   : > { %v1397_v49 = vadd.f32 %v1365_v41, %v1297_v45  ;;  %v899_v16 = vadd.f32 %v867_v12, %v798_v5  ;;  %v967_v34 = vmul.f32 %v2352_v28, %v2122_v48  ;;  %v1466_v30 = vmul.f32 %v2142_v63, %v2451_v23 }
  0x5e   : > { %1592 = vst.msk [vmem:[%s2225_s9 + $0x48] sm:$0xff] %vm513_vm1, %v1560_v8  ;;  %v1198_v13 = vadd.f32 %v1166_v46, %v1098_v32  ;;  %v699_v54 = vadd.f32 %v2099_v36, %v667_v25  ;;  %v767_v55 = vmul.f32 %v2407_v61, %v2102_v37  ;;  %v1067_v2 = vmul.f32 %v2410_v39, %v2128_v52  ;;  %v2511_v32 = vld [vmem:[#allocation2 + $0xca] sm:$0xff] }
  0x5f   : > { %v1497_v29 = vadd.f32 %v1465_v40, %v1397_v49  ;;  %v999_v10 = vadd.f32 %v967_v34, %v899_v16  ;;  %v1167_v28 = vmul.f32 %v2130_v53, %v2458_v17  ;;  %v868_v22 = vmul.f32 %v2119_v47, %v2466_v35  ;;  %v2518_v34 = vld [vmem:[#allocation2 + $0xd9] sm:$0xff] }
  0x60   : > { %v1298_v7 = vadd.f32 %v1266_v60, %v1198_v13  ;;  %v799_v24 = vadd.f32 %v767_v55, %v699_v54  ;;  %v668_v44 = vmul.f32 %v2379_v21, %v2087_v31  ;;  %v1267_v27 = vmul.f32 %v2373_v43, %v2137_v58  ;;  %v2520_v13 = vld [vmem:[#allocation2 + $0xe0] sm:$0xff] }
  0x61   : > { %v1561_v51 = vadd.f32 %v1497_v29, %v2036_v14  ;;  %v1099_v26 = vadd.f32 %v1067_v2, %v999_v10  ;;  %v968_v38 = vmul.f32 %v2377_v3, %v2122_v48  ;;  %v768_v21 = vmul.f32 %v2436_v33, %v2102_v37 }
  0x62   : > { %v1398_v41 = vadd.f32 %v1366_v50, %v1298_v7  ;;  %v900_v9 = vadd.f32 %v868_v22, %v799_v24  ;;  %v700_v11 = vadd.f32 %v2099_v36, %v668_v44  ;;  %v1367_v43 = vmul.f32 %v2427_v57, %v2140_v59 }
  0x63   : > { %1593 = vst.msk [vmem:[%s2225_s9 + $0x50] sm:$0xff] %vm513_vm1, %v1561_v51  ;;  %v1199_v14 = vadd.f32 %v1167_v28, %v1099_v26  ;;  %v1467_v3 = vmul.f32 %v2142_v63, %v2479_v62  ;;  %v1068_v40 = vmul.f32 %v2434_v0, %v2128_v52  ;;  %v869_v46 = vmul.f32 %v2119_v47, %v2490_v6  ;;  %v2539_v51 = vld [vmem:[#allocation2 + $0xda] sm:$0xff] }
  0x64   : > { %v1498_v42 = vadd.f32 %v1466_v30, %v1398_v41  ;;  %v1000_v1 = vadd.f32 %v968_v38, %v900_v9  ;;  %v800_v45 = vadd.f32 %v768_v21, %v700_v11  ;;  %v1168_v12 = vmul.f32 %v2130_v53, %v2492_v56  ;;  %v2541_v26 = vld [vmem:[#allocation2 + $0xe1] sm:$0xff]  ;;  %v2550_v21 = vld [vmem:[#allocation2 + $0xf0] sm:$0xff] }
  0x65   : > { %v1299_v5 = vadd.f32 %v1267_v27, %v1199_v14  ;;  %v1268_v8 = vmul.f32 %v2397_v4, %v2137_v58  ;;  %v669_v60 = vmul.f32 %v2407_v61, %v2087_v31  ;;  %v969_v16 = vmul.f32 %v2410_v39, %v2122_v48 }
  0x66   : > { %v1562_v25 = vadd.f32 %v1498_v42, %v2039_v15  ;;  %v1100_v49 = vadd.f32 %v1068_v40, %v1000_v1  ;;  %v901_v50 = vadd.f32 %v869_v46, %v800_v45  ;;  %v1368_v4 = vmul.f32 %v2451_v23, %v2140_v59  ;;  %v2563_v45 = vld [vmem:[#allocation2 + $0xe2] sm:$0xff] }
  0x67   : > { %v1399_v30 = vadd.f32 %v1367_v43, %v1299_v5  ;;  %v701_v54 = vadd.f32 %v2099_v36, %v669_v60  ;;  %v769_v61 = vmul.f32 %v2466_v35, %v2102_v37  ;;  %v1468_v55 = vmul.f32 %v2142_v63, %v2511_v32 }
  0x68   : > { %1594 = vst.msk [vmem:[%s2225_s9 + $0x58] sm:$0xff] %vm513_vm1, %v1562_v25  ;;  %v1200_v15 = vadd.f32 %v1168_v12, %v1100_v49  ;;  %v1001_v39 = vadd.f32 %v969_v16, %v901_v50  ;;  %v1069_v29 = vmul.f32 %v2458_v17, %v2128_v52  ;;  %v1169_v2 = vmul.f32 %v2130_v53, %v2518_v34  ;;  %v2571_v25 = vld [vmem:[#allocation2 + $0xf1] sm:$0xff] }
  0x69   : > { %v1499_v10 = vadd.f32 %v1467_v3, %v1399_v30  ;;  %v801_v28 = vadd.f32 %v769_v61, %v701_v54  ;;  %v870_v7 = vmul.f32 %v2119_v47, %v2520_v13  ;;  %v1269_v44 = vmul.f32 %v2427_v57, %v2137_v58  ;;  %v2578_v54 = vld [vmem:[#allocation2 + $0xf8] sm:$0xff] }
  0x6a   : > { %v1300_v24 = vadd.f32 %v1268_v8, %v1200_v15  ;;  %v1101_v22 = vadd.f32 %v1069_v29, %v1001_v39  ;;  %v670_v27 = vmul.f32 %v2436_v33, %v2087_v31  ;;  %v1369_v41 = vmul.f32 %v2479_v62, %v2140_v59 }
  0x6b   : > { %v1563_v38 = vadd.f32 %v1499_v10, %v2054_v18  ;;  %v902_v9 = vadd.f32 %v870_v7, %v801_v28  ;;  %v970_v11 = vmul.f32 %v2434_v0, %v2122_v48  ;;  %v770_v3 = vmul.f32 %v2490_v6, %v2102_v37  ;;  %v2591_v10 = vld [vmem:[#allocation2 + $0xf2] sm:$0xff] }
  0x6c   : > { %v1400_v14 = vadd.f32 %v1368_v4, %v1300_v24  ;;  %v1201_v57 = vadd.f32 %v1169_v2, %v1101_v22  ;;  %v702_v43 = vadd.f32 %v2099_v36, %v670_v27  ;;  %v1469_v18 = vmul.f32 %v2142_v63, %v2539_v51 }
  0x6d   : > { %1595 = vst.msk [vmem:[%s2225_s9 + $0x60] sm:$0xff] %vm513_vm1, %v1563_v38  ;;  %v1002_v33 = vadd.f32 %v970_v11, %v902_v9  ;;  %v1070_v40 = vmul.f32 %v2492_v56, %v2128_v52  ;;  %v1170_v0 = vmul.f32 %v2130_v53, %v2541_v26  ;;  %v871_v5 = vmul.f32 %v2119_v47, %v2550_v21  ;;  %v2602_v38 = vld [vmem:[#allocation2 + $0x108] sm:$0xff]  ;;  %v2604_v11 = vld [vmem:[#allocation2 + $0xf9] sm:$0xff] }
  0x6e   : > { %v1500_v42 = vadd.f32 %v1468_v55, %v1400_v14  ;;  %v1301_v1 = vadd.f32 %v1269_v44, %v1201_v57  ;;  %v802_v46 = vadd.f32 %v770_v3, %v702_v43  ;;  %v1270_v8 = vmul.f32 %v2451_v23, %v2137_v58 }
  0x6f   : > { %v1102_v12 = vadd.f32 %v1070_v40, %v1002_v33  ;;  %v1370_v60 = vmul.f32 %v2511_v32, %v2140_v59  ;;  %v671_v49 = vmul.f32 %v2466_v35, %v2087_v31  ;;  %v971_v4 = vmul.f32 %v2458_v17, %v2122_v48 }
  0x70   : > { %v1564_v50 = vadd.f32 %v1500_v42, %v2057_v19  ;;  %v1401_v16 = vadd.f32 %v1369_v41, %v1301_v1  ;;  %v903_v30 = vadd.f32 %v871_v5, %v802_v46  ;;  %v1470_v23 = vmul.f32 %v2142_v63, %v2563_v45  ;;  %v2624_v46 = vld [vmem:[#allocation2 + $0xfa] sm:$0xff] }
  0x71   : > { %v1202_v61 = vadd.f32 %v1170_v0, %v1102_v12  ;;  %v703_v15 = vadd.f32 %v2099_v36, %v671_v49  ;;  %v771_v55 = vmul.f32 %v2520_v13, %v2102_v37  ;;  %v1071_v39 = vmul.f32 %v2518_v34, %v2128_v52 }
  0x72   : > { %1596 = vst.msk [vmem:[%s2225_s9 + $0x68] sm:$0xff] %vm513_vm1, %v1564_v50  ;;  %v1501_v35 = vadd.f32 %v1469_v18, %v1401_v16  ;;  %v1003_v19 = vadd.f32 %v971_v4, %v903_v30  ;;  %v1171_v17 = vmul.f32 %v2130_v53, %v2571_v25  ;;  %v872_v28 = vmul.f32 %v2119_v47, %v2578_v54  ;;  %v2630_v50 = vld [vmem:[#allocation2 + $0x109] sm:$0xff] }
  0x73   : > { %v1302_v29 = vadd.f32 %v1270_v8, %v1202_v61  ;;  %v803_v2 = vadd.f32 %v771_v55, %v703_v15  ;;  %v672_v7 = vmul.f32 %v2490_v6, %v2087_v31  ;;  %v1271_v44 = vmul.f32 %v2479_v62, %v2137_v58  ;;  %v2632_v16 = vld [vmem:[#allocation2 + $0x110] sm:$0xff] }
  0x74   : > { %v1565_v24 = vadd.f32 %v1501_v35, %v2060_v20  ;;  %v1103_v22 = vadd.f32 %v1071_v39, %v1003_v19  ;;  %v972_v27 = vmul.f32 %v2492_v56, %v2122_v48  ;;  %v772_v6 = vmul.f32 %v2550_v21, %v2102_v37  ;;  %v1534_v20 = vld [vmem:[%s1978_s23 + $0x78] sm:$0xff] }
  0x75   : > { %v1402_v41 = vadd.f32 %v1370_v60, %v1302_v29  ;;  %v904_v9 = vadd.f32 %v872_v28, %v803_v2  ;;  %v704_v14 = vadd.f32 %v2099_v36, %v672_v7  ;;  %v1371_v62 = vmul.f32 %v2539_v51, %v2140_v59  ;;  %v2652_v7 = vld [vmem:[#allocation2 + $0x10a] sm:$0xff] }
  0x76   : > { %1597 = vst.msk [vmem:[%s2225_s9 + $0x70] sm:$0xff] %vm513_vm1, %v1565_v24  ;;  %v1203_v57 = vadd.f32 %v1171_v17, %v1103_v22  ;;  %v1471_v56 = vmul.f32 %v2142_v63, %v2591_v10  ;;  %v1072_v43 = vmul.f32 %v2541_v26, %v2128_v52  ;;  %v873_v40 = vmul.f32 %v2119_v47, %v2602_v38  ;;  %v2654_v24 = vld [vmem:[#allocation2 + $0x111] sm:$0xff] }
  0x77   : > { %v1502_v3 = vadd.f32 %v1470_v23, %v1402_v41  ;;  %v1004_v18 = vadd.f32 %v972_v27, %v904_v9  ;;  %v804_v33 = vadd.f32 %v772_v6, %v704_v14  ;;  %v1172_v42 = vmul.f32 %v2130_v53, %v2604_v11  ;;  %v2662_v14 = vld [vmem:[#allocation2 + $0x120] sm:$0xff] }
  0x78   : > { %v1303_v0 = vadd.f32 %v1271_v44, %v1203_v57  ;;  %v1272_v1 = vmul.f32 %v2511_v32, %v2137_v58  ;;  %v673_v5 = vmul.f32 %v2520_v13, %v2087_v31  ;;  %v973_v49 = vmul.f32 %v2518_v34, %v2122_v48  ;;  %v1535_v13 = vld [vmem:[%s1978_s23 + $0x80] sm:$0xff] }
  0x79   : > { %v1566_v12 = vadd.f32 %v1534_v20, %v1502_v3  ;;  %v1104_v8 = vadd.f32 %v1072_v43, %v1004_v18  ;;  %v905_v60 = vadd.f32 %v873_v40, %v804_v33  ;;  %v1372_v4 = vmul.f32 %v2563_v45, %v2140_v59  ;;  %v2676_v33 = vld [vmem:[#allocation2 + $0x112] sm:$0xff] }
  0x7a   : > { %v1403_v30 = vadd.f32 %v1371_v62, %v1303_v0  ;;  %v705_v32 = vadd.f32 %v2099_v36, %v673_v5  ;;  %v773_v61 = vmul.f32 %v2578_v54, %v2102_v37  ;;  %v1472_v34 = vmul.f32 %v2142_v63, %v2624_v46 }
  0x7b   : > { %1598 = vst.msk [vmem:[%s2225_s9 + $0x78] sm:$0xff] %vm513_vm1, %v1566_v12  ;;  %v1204_v23 = vadd.f32 %v1172_v42, %v1104_v8  ;;  %v1005_v15 = vadd.f32 %v973_v49, %v905_v60  ;;  %v1073_v55 = vmul.f32 %v2571_v25, %v2128_v52  ;;  %v1173_v19 = vmul.f32 %v2130_v53, %v2630_v50  ;;  %v2684_v12 = vld [vmem:[#allocation2 + $0x121] sm:$0xff] }
  0x7c   : > { %v1503_v35 = vadd.f32 %v1471_v56, %v1403_v30  ;;  %v805_v39 = vadd.f32 %v773_v61, %v705_v32  ;;  %v874_v17 = vmul.f32 %v2119_v47, %v2632_v16  ;;  %v1273_v28 = vmul.f32 %v2539_v51, %v2137_v58  ;;  %v2690_v32 = vld [vmem:[#allocation2 + $0x128] sm:$0xff]  ;;  %v1537_v61 = vld [vmem:[%s1978_s23 + $0x90] sm:$0xff] }
  0x7d   : > { %v1304_v29 = vadd.f32 %v1272_v1, %v1204_v23  ;;  %v1105_v2 = vadd.f32 %v1073_v55, %v1005_v15  ;;  %v674_v22 = vmul.f32 %v2550_v21, %v2087_v31  ;;  %v1373_v27 = vmul.f32 %v2591_v10, %v2140_v59  ;;  %v1536_v21 = vld [vmem:[%s1978_s23 + $0x88] sm:$0xff] }
  0x7e   : > { %v1567_v44 = vadd.f32 %v1535_v13, %v1503_v35  ;;  %v906_v41 = vadd.f32 %v874_v17, %v805_v39  ;;  %v974_v9 = vmul.f32 %v2541_v26, %v2122_v48  ;;  %v774_v57 = vmul.f32 %v2602_v38, %v2102_v37 }
  0x7f   : > { %v1404_v6 = vadd.f32 %v1372_v4, %v1304_v29  ;;  %v1205_v20 = vadd.f32 %v1173_v19, %v1105_v2  ;;  %v706_v51 = vadd.f32 %v2099_v36, %v674_v22  ;;  %v1473_v62 = vmul.f32 %v2142_v63, %v2652_v7  ;;  %v2704_v19 = vld [vmem:[#allocation2 + $0x122] sm:$0xff] }
  0x80   : > { %1599 = vst.msk [vmem:[%s2225_s9 + $0x80] sm:$0xff] %vm513_vm1, %v1567_v44  ;;  %v1006_v56 = vadd.f32 %v974_v9, %v906_v41  ;;  %v1074_v43 = vmul.f32 %v2604_v11, %v2128_v52  ;;  %v1174_v26 = vmul.f32 %v2130_v53, %v2654_v24  ;;  %v875_v0 = vmul.f32 %v2119_v47, %v2662_v14  ;;  %v2714_v44 = vld [vmem:[#allocation2 + $0x138] sm:$0xff]  ;;  %v2716_v9 = vld [vmem:[#allocation2 + $0x129] sm:$0xff] }
  0x81   : > { %v1504_v3 = vadd.f32 %v1472_v34, %v1404_v6  ;;  %v1305_v18 = vadd.f32 %v1273_v28, %v1205_v20  ;;  %v806_v40 = vadd.f32 %v774_v57, %v706_v51  ;;  %v1274_v1 = vmul.f32 %v2563_v45, %v2137_v58  ;;  %v2721_v6 = vld [vmem:[%s2997_s4] ss:$0 sm:$0xff] }
  0x82   : > { %v1106_v42 = vadd.f32 %v1074_v43, %v1006_v56  ;;  %v1374_v5 = vmul.f32 %v2624_v46, %v2140_v59  ;;  %v675_v8 = vmul.f32 %v2578_v54, %v2087_v31  ;;  %v975_v4 = vmul.f32 %v2571_v25, %v2122_v48 }
  0x83   : > { %v1568_v60 = vadd.f32 %v1536_v21, %v1504_v3  ;;  %v1405_v49 = vadd.f32 %v1373_v27, %v1305_v18  ;;  %v907_v30 = vadd.f32 %v875_v0, %v806_v40  ;;  %v1474_v45 = vmul.f32 %v2142_v63, %v2676_v33  ;;  %v2741_v0 = vld [vmem:[#allocation2 + $0x12a] sm:$0xff] }
  0x84   : > { %v1206_v13 = vadd.f32 %v1174_v26, %v1106_v42  ;;  %v707_v23 = vadd.f32 %v2099_v36, %v675_v8  ;;  %v775_v34 = vmul.f32 %v2632_v16, %v2102_v37  ;;  %v1075_v55 = vmul.f32 %v2630_v50, %v2128_v52 }
  0x85   : > { %1600 = vst.msk [vmem:[%s2225_s9 + $0x88] sm:$0xff] %vm513_vm1, %v1568_v60  ;;  %v1505_v54 = vadd.f32 %v1473_v62, %v1405_v49  ;;  %v1007_v15 = vadd.f32 %v975_v4, %v907_v30  ;;  %v1175_v25 = vmul.f32 %v2130_v53, %v2684_v12  ;;  %v876_v36 = vmul.f32 %v2119_v47, %v2690_v32  ;;  %v2747_v49 = vld [vmem:[#allocation2 + $0x139] sm:$0xff] }
  0x86   : > { %v1306_v35 = vadd.f32 %v1274_v1, %v1206_v13  ;;  %v807_v39 = vadd.f32 %v775_v34, %v707_v23  ;;  %v676_v17 = vmul.f32 %v2602_v38, %v2087_v31  ;;  %v1275_v28 = vmul.f32 %v2591_v10, %v2137_v58  ;;  %v1538_v10 = vld [vmem:[%s1978_s23 + $0x98] sm:$0xff]  ;;  %v2749_v30 = vld [vmem:[#allocation2 + $0x140] sm:$0xff] }
  0x87   : > { %v1569_v29 = vadd.f32 %v1537_v61, %v1505_v54  ;;  %v1107_v2 = vadd.f32 %v1075_v55, %v1007_v15  ;;  %v976_v22 = vmul.f32 %v2604_v11, %v2122_v48  ;;  %v776_v20 = vmul.f32 %v2662_v14, %v2102_v37 }
  0x88   : > { %v1406_v27 = vadd.f32 %v1374_v5, %v1306_v35  ;;  %v908_v41 = vadd.f32 %v876_v36, %v807_v39  ;;  %v708_v38 = vadd.f32 %v2721_v6, %v676_v17  ;;  %v1375_v51 = vmul.f32 %v2652_v7, %v2140_v59  ;;  %v2769_v17 = vld [vmem:[#allocation2 + $0x13a] sm:$0xff] }
  0x89   : > { %1601 = vst.msk [vmem:[%s2225_s9 + $0x90] sm:$0xff] %vm513_vm1, %v1569_v29  ;;  %v1207_v11 = vadd.f32 %v1175_v25, %v1107_v2  ;;  %v1475_v57 = vmul.f32 %v2142_v63, %v2704_v19  ;;  %v1076_v21 = vmul.f32 %v2654_v24, %v2128_v52  ;;  %v877_v26 = vmul.f32 %v2119_v47, %v2714_v44  ;;  %v2771_v29 = vld [vmem:[#allocation2 + $0x141] sm:$0xff] }
  0x8a   : > { %v1506_v62 = vadd.f32 %v1474_v45, %v1406_v27  ;;  %v1008_v56 = vadd.f32 %v976_v22, %v908_v41  ;;  %v808_v43 = vadd.f32 %v776_v20, %v708_v38  ;;  %v1176_v18 = vmul.f32 %v2130_v53, %v2716_v9  ;;  %v2779_v38 = vld [vmem:[#allocation2 + $0x150] sm:$0xff] }
  0x8b   : > { %v1307_v3 = vadd.f32 %v1275_v28, %v1207_v11  ;;  %v1276_v40 = vmul.f32 %v2624_v46, %v2137_v58  ;;  %v677_v42 = vmul.f32 %v2632_v16, %v2087_v31  ;;  %v977_v60 = vmul.f32 %v2630_v50, %v2122_v48  ;;  %v1539_v16 = vld [vmem:[%s1978_s23 + $0xa0] sm:$0xff] }
  0x8c   : > { %v1570_v1 = vadd.f32 %v1538_v10, %v1506_v62  ;;  %v1108_v5 = vadd.f32 %v1076_v21, %v1008_v56  ;;  %v909_v8 = vadd.f32 %v877_v26, %v808_v43  ;;  %v1376_v61 = vmul.f32 %v2676_v33, %v2140_v59  ;;  %v2793_v43 = vld [vmem:[#allocation2 + $0x142] sm:$0xff] }
  0x8d   : > { %v1407_v4 = vadd.f32 %v1375_v51, %v1307_v3  ;;  %v709_v46 = vadd.f32 %v2721_v6, %v677_v42  ;;  %v777_v13 = vmul.f32 %v2690_v32, %v2102_v37  ;;  %v1476_v50 = vmul.f32 %v2142_v63, %v2741_v0 }
  0x8e   : > { %1602 = vst.msk [vmem:[%s2225_s9 + $0x98] sm:$0xff] %vm513_vm1, %v1570_v1  ;;  %v1208_v45 = vadd.f32 %v1176_v18, %v1108_v5  ;;  %v1009_v23 = vadd.f32 %v977_v60, %v909_v8  ;;  %v1077_v34 = vmul.f32 %v2684_v12, %v2128_v52  ;;  %v1177_v15 = vmul.f32 %v2130_v53, %v2747_v49  ;;  %v2801_v1 = vld [vmem:[#allocation2 + $0x151] sm:$0xff] }
  0x8f   : > { %v1507_v54 = vadd.f32 %v1475_v57, %v1407_v4  ;;  %v809_v55 = vadd.f32 %v777_v13, %v709_v46  ;;  %v878_v25 = vmul.f32 %v2119_v47, %v2749_v30  ;;  %v1277_v36 = vmul.f32 %v2652_v7, %v2137_v58  ;;  %v2807_v46 = vld [vmem:[#allocation2 + $0x158] sm:$0xff]  ;;  %v1541_v13 = vld [vmem:[%s1978_s23 + $0xb0] sm:$0xff] }
  0x90   : > { %v1308_v35 = vadd.f32 %v1276_v40, %v1208_v45  ;;  %v1109_v39 = vadd.f32 %v1077_v34, %v1009_v23  ;;  %v678_v2 = vmul.f32 %v2662_v14, %v2087_v31  ;;  %v1377_v22 = vmul.f32 %v2704_v19, %v2140_v59  ;;  %v1540_v14 = vld [vmem:[%s1978_s23 + $0xa8] sm:$0xff] }
  0x91   : > { %v1571_v28 = vadd.f32 %v1539_v16, %v1507_v54  ;;  %v910_v27 = vadd.f32 %v878_v25, %v809_v55  ;;  %v978_v41 = vmul.f32 %v2654_v24, %v2122_v48  ;;  %v778_v11 = vmul.f32 %v2714_v44, %v2102_v37 }
  0x92   : > { %v1408_v20 = vadd.f32 %v1376_v61, %v1308_v35  ;;  %v1209_v10 = vadd.f32 %v1177_v15, %v1109_v39  ;;  %v710_v7 = vadd.f32 %v2721_v6, %v678_v2  ;;  %v1477_v51 = vmul.f32 %v2142_v63, %v2769_v17  ;;  %v2821_v15 = vld [vmem:[#allocation2 + $0x152] sm:$0xff] }
  0x93   : > { %1603 = vst.msk [vmem:[%s2225_s9 + $0xa0] sm:$0xff] %vm513_vm1, %v1571_v28  ;;  %v1010_v57 = vadd.f32 %v978_v41, %v910_v27  ;;  %v1078_v21 = vmul.f32 %v2716_v9, %v2128_v52  ;;  %v1178_v24 = vmul.f32 %v2130_v53, %v2771_v29  ;;  %v879_v3 = vmul.f32 %v2119_v47, %v2779_v38 }
  0x94   : > { %v1508_v62 = vadd.f32 %v1476_v50, %v1408_v20  ;;  %v1309_v56 = vadd.f32 %v1277_v36, %v1209_v10  ;;  %v810_v26 = vadd.f32 %v778_v11, %v710_v7  ;;  %v1278_v40 = vmul.f32 %v2676_v33, %v2137_v58  ;;  %v2833_v20 = vld [vmem:[#allocation2 + $0x159] sm:$0xff] }
  0x95   : > { %v1110_v18 = vadd.f32 %v1078_v21, %v1010_v57  ;;  %v1378_v42 = vmul.f32 %v2741_v0, %v2140_v59  ;;  %v679_v5 = vmul.f32 %v2690_v32, %v2087_v31  ;;  %v979_v61 = vmul.f32 %v2684_v12, %v2122_v48 }
  0x96   : > { %v1572_v8 = vadd.f32 %v1540_v14, %v1508_v62  ;;  %v1409_v60 = vadd.f32 %v1377_v22, %v1309_v56  ;;  %v911_v4 = vadd.f32 %v879_v3, %v810_v26  ;;  %v1478_v33 = vmul.f32 %v2142_v63, %v2793_v43  ;;  %v2831_v22 = vld [vmem:[#allocation2 + $0x168] sm:$0xff]  ;;  %v2853_v3 = vld [vmem:[#allocation2 + $0x15a] sm:$0xff] }
  0x97   : > { %v1210_v16 = vadd.f32 %v1178_v24, %v1110_v18  ;;  %v711_v45 = vadd.f32 %v2721_v6, %v679_v5  ;;  %v779_v50 = vmul.f32 %v2749_v30, %v2102_v37  ;;  %v1079_v34 = vmul.f32 %v2747_v49, %v2128_v52 }
  0x98   : > { %1604 = vst.msk [vmem:[%s2225_s9 + $0xa8] sm:$0xff] %vm513_vm1, %v1572_v8  ;;  %v1509_v32 = vadd.f32 %v1477_v51, %v1409_v60  ;;  %v1011_v23 = vadd.f32 %v979_v61, %v911_v4  ;;  %v1179_v12 = vmul.f32 %v2130_v53, %v2801_v1  ;;  %v880_v25 = vmul.f32 %v2119_v47, %v2807_v46  ;;  %v2859_v60 = vld [vmem:[#allocation2 + $0x169] sm:$0xff] }
  0x99   : > { %v1310_v54 = vadd.f32 %v1278_v40, %v1210_v16  ;;  %v811_v55 = vadd.f32 %v779_v50, %v711_v45  ;;  %v680_v35 = vmul.f32 %v2714_v44, %v2087_v31  ;;  %v1279_v2 = vmul.f32 %v2704_v19, %v2137_v58  ;;  %v1542_v44 = vld [vmem:[%s1978_s23 + $0xb8] sm:$0xff]  ;;  %v2861_v4 = vld [vmem:[#allocation2 + $0x170] sm:$0xff] }
  0x9a   : > { %v1573_v39 = vadd.f32 %v1541_v13, %v1509_v32  ;;  %v1111_v36 = vadd.f32 %v1079_v34, %v1011_v23  ;;  %v980_v28 = vmul.f32 %v2716_v9, %v2122_v48  ;;  %v780_v7 = vmul.f32 %v2779_v38, %v2102_v37 }
  0x9b   : > { %v1410_v27 = vadd.f32 %v1378_v42, %v1310_v54  ;;  %v912_v41 = vadd.f32 %v880_v25, %v811_v55  ;;  %v712_v10 = vadd.f32 %v2721_v6, %v680_v35  ;;  %v1379_v19 = vmul.f32 %v2769_v17, %v2140_v59  ;;  %v2881_v35 = vld [vmem:[#allocation2 + $0x16a] sm:$0xff] }
  0x9c   : > { %1605 = vst.msk [vmem:[%s2225_s9 + $0xb0] sm:$0xff] %vm513_vm1, %v1573_v39  ;;  %v1211_v11 = vadd.f32 %v1179_v12, %v1111_v36  ;;  %v1479_v9 = vmul.f32 %v2142_v63, %v2821_v15  ;;  %v1080_v14 = vmul.f32 %v2771_v29, %v2128_v52  ;;  %v881_v24 = vmul.f32 %v2119_v47, %v2831_v22  ;;  %v2883_v39 = vld [vmem:[#allocation2 + $0x171] sm:$0xff] }
  0x9d   : > { %v1510_v51 = vadd.f32 %v1478_v33, %v1410_v27  ;;  %v1012_v57 = vadd.f32 %v980_v28, %v912_v41  ;;  %v812_v21 = vadd.f32 %v780_v7, %v712_v10  ;;  %v1180_v56 = vmul.f32 %v2130_v53, %v2833_v20  ;;  %v847_v10 = vld [vmem:[#allocation2 + $0x180] sm:$0xff] }
  0x9e   : > { %v1311_v62 = vadd.f32 %v1279_v2, %v1211_v11  ;;  %v1280_v26 = vmul.f32 %v2741_v0, %v2137_v58  ;;  %v681_v18 = vmul.f32 %v2749_v30, %v2087_v31  ;;  %v981_v8 = vmul.f32 %v2747_v49, %v2122_v48  ;;  %v1543_v30 = vld [vmem:[%s1978_s23 + $0xc0] sm:$0xff] }
  0x9f   : > { %v1574_v40 = vadd.f32 %v1542_v44, %v1510_v51  ;;  %v1112_v42 = vadd.f32 %v1080_v14, %v1012_v57  ;;  %v913_v5 = vadd.f32 %v881_v24, %v812_v21  ;;  %v1380_v13 = vmul.f32 %v2793_v43, %v2140_v59  ;;  %v2903_v21 = vld [vmem:[#allocation2 + $0x172] sm:$0xff] }
  0xa0   : > { %v1411_v61 = vadd.f32 %v1379_v19, %v1311_v62  ;;  %v713_v0 = vadd.f32 %v2721_v6, %v681_v18  ;;  %v781_v16 = vmul.f32 %v2807_v46, %v2102_v37  ;;  %v1480_v49 = vmul.f32 %v2142_v63, %v2853_v3  ;;  %v1544_v19 = vld [vmem:[%s1978_s23 + $0xc8] sm:$0xff] }
  0xa1   : > { %1606 = vst.msk [vmem:[%s2225_s9 + $0xb8] sm:$0xff] %vm513_vm1, %v1574_v40  ;;  %v1212_v33 = vadd.f32 %v1180_v56, %v1112_v42  ;;  %v1013_v45 = vadd.f32 %v981_v8, %v913_v5  ;;  %v1081_v50 = vmul.f32 %v2801_v1, %v2128_v52  ;;  %v1181_v23 = vmul.f32 %v2130_v53, %v2859_v60  ;;  %v1147_v40 = vld [vmem:[#allocation2 + $0x181] sm:$0xff] }
  0xa2   : > { %v1511_v32 = vadd.f32 %v1479_v9, %v1411_v61  ;;  %v813_v34 = vadd.f32 %v781_v16, %v713_v0  ;;  %v882_v12 = vmul.f32 %v2119_v47, %v2861_v4  ;;  %v1281_v25 = vmul.f32 %v2769_v17, %v2137_v58  ;;  %v848_v0 = vld [vmem:[#allocation2 + $0x188] sm:$0xff]  ;;  %v1545_v16 = vld [vmem:[%s1978_s23 + $0xd0] sm:$0xff] }
  0xa3   : > { %v1312_v54 = vadd.f32 %v1280_v26, %v1212_v33  ;;  %v1113_v55 = vadd.f32 %v1081_v50, %v1013_v45  ;;  %v682_v36 = vmul.f32 %v2779_v38, %v2087_v31  ;;  %v1381_v28 = vmul.f32 %v2821_v15, %v2140_v59 }
  0xa4   : > { %v1575_v2 = vadd.f32 %v1543_v30, %v1511_v32  ;;  %v914_v27 = vadd.f32 %v882_v12, %v813_v34  ;;  %v982_v41 = vmul.f32 %v2771_v29, %v2122_v48  ;;  %v782_v11 = vmul.f32 %v2831_v22, %v2102_v37  ;;  %v849_v32 = vld [vmem:[#allocation2 + $0x198] sm:$0xff] }
  0xa5   : > { %v1412_v7 = vadd.f32 %v1380_v13, %v1312_v54  ;;  %v1213_v44 = vadd.f32 %v1181_v23, %v1113_v55  ;;  %v714_v17 = vadd.f32 %v2721_v6, %v682_v36  ;;  %v1481_v38 = vmul.f32 %v2142_v63, %v2881_v35 }
  0xa6   : > { %1607 = vst.msk [vmem:[%s2225_s9 + $0xc0] sm:$0xff] %vm513_vm1, %v1575_v2  ;;  %v1014_v9 = vadd.f32 %v982_v41, %v914_v27  ;;  %v1082_v14 = vmul.f32 %v2833_v20, %v2128_v52  ;;  %v1182_v29 = vmul.f32 %v2130_v53, %v2883_v39  ;;  %v883_v62 = vmul.f32 %v2119_v47, %v847_v10  ;;  %v1148_v41 = vld [vmem:[#allocation2 + $0x189] sm:$0xff] }
  0xa7   : > { %v1512_v51 = vadd.f32 %v1480_v49, %v1412_v7  ;;  %v1313_v57 = vadd.f32 %v1281_v25, %v1213_v44  ;;  %v814_v24 = vadd.f32 %v782_v11, %v714_v17  ;;  %v1282_v26 = vmul.f32 %v2793_v43, %v2137_v58  ;;  %v1546_v17 = vld [vmem:[%s1978_s23 + $0xd8] sm:$0xff] }
  0xa8   : > { %v1114_v56 = vadd.f32 %v1082_v14, %v1014_v9  ;;  %v1382_v18 = vmul.f32 %v2853_v3, %v2140_v59  ;;  %v683_v42 = vmul.f32 %v2807_v46, %v2087_v31  ;;  %v983_v13 = vmul.f32 %v2801_v1, %v2122_v48 }
  0xa9   : > { %v1576_v5 = vadd.f32 %v1544_v19, %v1512_v51  ;;  %v1413_v8 = vadd.f32 %v1381_v28, %v1313_v57  ;;  %v915_v61 = vadd.f32 %v883_v62, %v814_v24  ;;  %v1482_v33 = vmul.f32 %v2142_v63, %v2903_v21 }
  0xaa   : > { %v1214_v30 = vadd.f32 %v1182_v29, %v1114_v56  ;;  %v715_v43 = vadd.f32 %v2721_v6, %v683_v42  ;;  %v783_v49 = vmul.f32 %v2861_v4, %v2102_v37  ;;  %v1083_v50 = vmul.f32 %v2859_v60, %v2128_v52  ;;  %v850_v29 = vld [vmem:[#allocation2 + $0x1a0] sm:$0xff] }
  0xab   : > { %1608 = vst.msk [vmem:[%s2225_s9 + $0xc8] sm:$0xff] %vm513_vm1, %v1576_v5  ;;  %v1513_v46 = vadd.f32 %v1481_v38, %v1413_v8  ;;  %v1015_v45 = vadd.f32 %v983_v13, %v915_v61  ;;  %v1183_v1 = vmul.f32 %v2130_v53, %v1147_v40  ;;  %v884_v12 = vmul.f32 %v2119_v47, %v848_v0  ;;  %v1447_v38 = vld [vmem:[#allocation2 + $0x182] sm:$0xff]  ;;  %v1149_v8 = vld [vmem:[#allocation2 + $0x199] sm:$0xff] }
  0xac   : > { %v1314_v23 = vadd.f32 %v1282_v26, %v1214_v30  ;;  %v815_v34 = vadd.f32 %v783_v49, %v715_v43  ;;  %v684_v54 = vmul.f32 %v2831_v22, %v2087_v31  ;;  %v984_v36 = vmul.f32 %v2833_v20, %v2122_v48  ;;  %v1448_v30 = vld [vmem:[#allocation2 + $0x18a] sm:$0xff] }
  0xad   : > { %v1577_v55 = vadd.f32 %v1545_v16, %v1513_v46  ;;  %v1115_v25 = vadd.f32 %v1083_v50, %v1015_v45  ;;  %v784_v2 = vmul.f32 %v847_v10, %v2102_v37  ;;  %v885_v44 = vmul.f32 %v2119_v47, %v849_v32  ;;  %v1547_v16 = vld [vmem:[%s1978_s23 + $0xe0] sm:$0xff] }
  0xae   : > { %v1414_v28 = vadd.f32 %v1382_v18, %v1314_v23  ;;  %v916_v27 = vadd.f32 %v884_v12, %v815_v34  ;;  %v716_v7 = vadd.f32 %v2721_v6, %v684_v54  ;;  %v1283_v22 = vmul.f32 %v2821_v15, %v2137_v58  ;;  %v1150_v23 = vld [vmem:[#allocation2 + $0x1a1] sm:$0xff] }
  0xaf   : > { %1609 = vst.msk [vmem:[%s2225_s9 + $0xd0] sm:$0xff] %vm513_vm1, %v1577_v55  ;;  %v1215_v11 = vadd.f32 %v1183_v1, %v1115_v25  ;;  %v1383_v19 = vmul.f32 %v2881_v35, %v2140_v59  ;;  %v1084_v9 = vmul.f32 %v2883_v39, %v2128_v52  ;;  %v1184_v57 = vmul.f32 %v2130_v53, %v1148_v41  ;;  %v1548_v34 = vld [vmem:[%s1978_s23 + $0xe8] sm:$0xff]  ;;  %v1449_v12 = vld [vmem:[#allocation2 + $0x19a] sm:$0xff] }
  0xb0   : > { %v1514_v20 = vadd.f32 %v1482_v33, %v1414_v28  ;;  %v1016_v10 = vadd.f32 %v984_v36, %v916_v27  ;;  %v816_v14 = vadd.f32 %v784_v2, %v716_v7  ;;  %v685_v24 = vmul.f32 %v2861_v4, %v2087_v31  ;;  %v1549_v7 = vld [vmem:[%s1978_s23 + $0xf0] sm:$0xff] }
  0xb1   : > { %v1315_v51 = vadd.f32 %v1283_v22, %v1215_v11  ;;  %v785_v15 = vmul.f32 %v848_v0, %v2102_v37  ;;  %v985_v18 = vmul.f32 %v2859_v60, %v2122_v48  ;;  %v1483_v5 = vmul.f32 %v2142_v63, %v1447_v38 }
  0xb2   : > { %v1578_v62 = vadd.f32 %v1546_v17, %v1514_v20  ;;  %v1116_v56 = vadd.f32 %v1084_v9, %v1016_v10  ;;  %v917_v26 = vadd.f32 %v885_v44, %v816_v14  ;;  %v717_v61 = vadd.f32 %v2721_v6, %v685_v24 }
  0xb3   : > { %v1415_v42 = vadd.f32 %v1383_v19, %v1315_v51  ;;  %v886_v13 = vmul.f32 %v2119_v47, %v850_v29  ;;  %v1284_v37 = vmul.f32 %v2853_v3, %v2137_v58  ;;  %v1085_v0 = vmul.f32 %v1147_v40, %v2128_v52 }
  0xb4   : > { %1610 = vst.msk [vmem:[%s2225_s9 + $0xd8] sm:$0xff] %vm513_vm1, %v1578_v62  ;;  %v1216_v31 = vadd.f32 %v1184_v57, %v1116_v56  ;;  %v1017_v4 = vadd.f32 %v985_v18, %v917_v26  ;;  %v817_v33 = vadd.f32 %v785_v15, %v717_v61  ;;  %v1384_v6 = vmul.f32 %v2903_v21, %v2140_v59 }
  0xb5   : > { %v1515_v60 = vadd.f32 %v1483_v5, %v1415_v42  ;;  %v1185_v49 = vmul.f32 %v2130_v53, %v1149_v8  ;;  %v986_v3 = vmul.f32 %v2883_v39, %v2122_v48  ;;  %v1484_v40 = vmul.f32 %v2142_v63, %v1448_v30 }
  0xb6   : > { %v1316_v43 = vadd.f32 %v1284_v37, %v1216_v31  ;;  %v1117_v47 = vadd.f32 %v1085_v0, %v1017_v4  ;;  %v918_v45 = vadd.f32 %v886_v13, %v817_v33  ;;  %v1285_v32 = vmul.f32 %v2881_v35, %v2137_v58 }
  0xb7   : > { %v1579_v46 = vadd.f32 %v1547_v16, %v1515_v60  ;;  %v1086_v55 = vmul.f32 %v1148_v41, %v2128_v52  ;;  %v1385_v48 = vmul.f32 %v1447_v38, %v2140_v59  ;;  %v1186_v2 = vmul.f32 %v2130_v53, %v1150_v23  ;;  %v1450_v41 = vld [vmem:[#allocation2 + $0x1a2] sm:$0xff]  ;;  %v1550_v38 = vld [vmem:[%s1978_s23 + $0xf8] sm:$0xff] }
  0xb8   : > { %v1416_v50 = vadd.f32 %v1384_v6, %v1316_v43  ;;  %v1217_v1 = vadd.f32 %v1185_v49, %v1117_v47  ;;  %v1018_v54 = vadd.f32 %v986_v3, %v918_v45  ;;  %v1485_v27 = vmul.f32 %v2142_v63, %v1449_v12 }
  0xb9   : > { %1611 = vst.msk [vmem:[%s2225_s9 + $0xe0] sm:$0xff] %vm513_vm1, %v1579_v46  ;;  %v1286_v17 = vmul.f32 %v2903_v21, %v2137_v58  ;;  %v1386_v22 = vmul.f32 %v1448_v30, %v2140_v59  ;;  %v1486_v20 = vmul.f32 %v2142_v63, %v1450_v41 }
  0xba   : > { %v1516_v25 = vadd.f32 %v1484_v40, %v1416_v50  ;;  %v1317_v36 = vadd.f32 %v1285_v32, %v1217_v1  ;;  %v1118_v39 = vadd.f32 %v1086_v55, %v1018_v54 }
  0xbc   : > { %v1580_v28 = vadd.f32 %v1548_v34, %v1516_v25  ;;  %v1417_v35 = vadd.f32 %v1385_v48, %v1317_v36  ;;  %v1218_v44 = vadd.f32 %v1186_v2, %v1118_v39 }
  0xbe   : > { %1612 = vst.msk [vmem:[%s2225_s9 + $0xe8] sm:$0xff] %vm513_vm1, %v1580_v28  ;;  %v1517_v52 = vadd.f32 %v1485_v27, %v1417_v35  ;;  %v1318_v11 = vadd.f32 %v1286_v17, %v1218_v44 }
  0xc0   : > { %v1581_v19 = vadd.f32 %v1549_v7, %v1517_v52  ;;  %v1418_v53 = vadd.f32 %v1386_v22, %v1318_v11 }
  0xc2   : > { %1613 = vst.msk [vmem:[%s2225_s9 + $0xf0] sm:$0xff] %vm513_vm1, %v1581_v19  ;;  %v1518_v10 = vadd.f32 %v1486_v20, %v1418_v53 }
  0xc4   : > { %v1582_v9 = vadd.f32 %v1550_v38, %v1518_v10 }
  0xc6   : > { %1614 = vst.msk [vmem:[%s2225_s9 + $0xf8] sm:$0xff] %vm513_vm1, %v1582_v9 }
  0xc7 PF: > { %s15_s20 = sadd.s32 1, %s1873_s20   ;;  %s2999_s18 = smov %s1869_s19 }
  0xc8   : > { %p12_p5 = scmp.ge.s32.totalorder %s15_s20, 4   ;;  %s3000_s19 = smov %s3002_s1 }
  0xca   :  { %14 = sbr.rel (!%p12_p5) target bundleno = 2 (0x2), region = 102 }

</bundles_post_ra>
